<compile_context>
chip_gen: v7x
topology: tpu7x:2x2x1
jax: 0.10.0
libtpu: 0.0.40
codegen_flags: <defaults>
</compile_context>

<pallas_src>
import functools

import jax
import jax.numpy as jnp
from jax.experimental import pallas as pl
from jax.experimental.pallas import tpu as pltpu


def _relation_kernel(q_ref, r_ref, wq_ref, wr_ref, out_ref):
    """One batch tile of fused question/relation embedding + cosine score.

    q_ref  : [TB, (Lq+1)*E] bf16  masked+scaled question tokens (flat) ++ entity emb
    r_ref  : [TB, (Lr+1)*E] bf16  relation tokens (flat) ++ rel_emb
    wq_ref : [(Lq+1)*E, H]  bf16  [tile(Wq, Lq); Wq]    (pooling folded in)
    wr_ref : [(Lr+1)*E, H]  bf16  [tile(Wr/Lr, Lr); Wr] (mean-pool folded in)
    out_ref: [1, TB]        f32   cosine similarity (lane-dense row)
    """
    f32 = jnp.float32

    # Projections (pooling + entity/rel add are folded into the weights):
    # bf16 operands on the MXU, f32 accumulation.
    q_emb = jnp.dot(q_ref[...], wq_ref[...], preferred_element_type=f32)   # [TB, H]
    r_emb = jnp.dot(r_ref[...], wr_ref[...], preferred_element_type=f32)   # [TB, H]

    # Cosine similarity (torch F.cosine_similarity, dim=1, eps=1e-8).
    # Per-row reductions as MXU contractions against a ones vector so results
    # are already lane-dense [1, TB] (dense vst, no column->row relayout).
    ones_row = jnp.ones((1, q_emb.shape[1]), f32)

    def _row_sum(p):                                                        # [TB,H] -> [1,TB]
        return jax.lax.dot_general(ones_row, p, (((1,), (1,)), ((), ())),
                                   preferred_element_type=f32)

    qr = _row_sum(q_emb * r_emb)
    qq = _row_sum(q_emb * q_emb)
    rr = _row_sum(r_emb * r_emb)
    eps2 = 1e-16                                                            # (1e-8) ** 2
    out_ref[...] = (qr * jax.lax.rsqrt(jnp.maximum(qq, eps2))
                       * jax.lax.rsqrt(jnp.maximum(rr, eps2)))


def _round_up(x, m):
    return ((x + m - 1) // m) * m


def _choose_batch_tile(B, row_bytes):
    """Rows per grid step.

    `row_bytes` is the *lane-padded* per-row payload (minor dims rounded to
    128 lanes), so the estimate matches real VMEM tiles.  Target ~8 MiB of
    streamed payload per step -> ~16 MiB double-buffered, well under the
    32 MiB vmem_limit we request (and comfortable on v7x's 64 MiB physical).
    Guarantees >=2 grid steps when the batch allows, so
    dimension_semantics=("parallel",) can shard across v7x's two TensorCores.
    """
    budget = 8 << 20
    tb = max(128, (budget // max(row_bytes, 1)) // 128 * 128)
    b128 = _round_up(B, 128)
    if b128 >= 256:
        tb = min(tb, max(128, (b128 // 2) // 128 * 128))   # >= 2 grid steps
    else:
        tb = min(tb, b128)                                  # single lane-dense tile
    return tb


def relation_model_forward(params, words, chars, entities, r_words, rel_emb,
                           method, mask, predict):
    """Embedding lookups (XLA glue) + one fused, batch-tiled Pallas kernel."""
    del method, predict  # TODO(synk): control flags of the unspecified
    # QuestionEmb/RelationEmb submodules have no defined semantics here.

    B, Lq = words.shape
    Lr = r_words.shape[1]
    E = params["word_table"].shape[1]
    H = params["wq"].shape[1]
    bf16 = jnp.bfloat16
    f32 = jnp.float32

    # ---- glue: gathers + mask folding + lane-dense flattening (fuses in XLA) ----
    q_tok = (params["word_table"][words]
             + jnp.mean(params["char_table"][chars], axis=2))               # [B,Lq,E] f32
    mask_f = mask.astype(f32)                                               # [B,Lq]
    inv_cnt = 1.0 / jnp.maximum(jnp.sum(mask_f, axis=1, keepdims=True), 1.0)
    scale = (mask_f * inv_cnt)[:, :, None]                                  # [B,Lq,1]
    q_flat = (q_tok * scale).astype(bf16).reshape(B, Lq * E)                # [B,Lq*E]
    ent = params["ent_table"][entities].astype(bf16)                        # [B,E]
    q_stream = jnp.concatenate([q_flat, ent], axis=1)                       # [B,(Lq+1)*E]

    # TODO(synk): RelationEmb internals are unspecified; relation words are
    # mean-pooled without a padding mask, so pad tokens in r_words would leak in.
    r_flat = params["word_table"][r_words].astype(bf16).reshape(B, Lr * E)  # [B,Lr*E]
    r_stream = jnp.concatenate([r_flat, rel_emb.astype(bf16)], axis=1)      # [B,(Lr+1)*E]

    # Pooling folded into the projection weights:
    #   q_emb = (sum_l mask_l/cnt * q_tok_l + ent) @ Wq
    #   r_emb = (mean_l r_tok_l + rel_emb)        @ Wr
    wq = params["wq"].astype(f32)                                           # [E,H]
    wr = params["wr"].astype(f32)                                           # [E,H]
    wq_all = jnp.concatenate([jnp.tile(wq, (Lq, 1)), wq], axis=0).astype(bf16)       # [(Lq+1)*E,H]
    wr_all = jnp.concatenate([jnp.tile(wr / Lr, (Lr, 1)), wr], axis=0).astype(bf16)  # [(Lr+1)*E,H]

    Dq, Dr = (Lq + 1) * E, (Lr + 1) * E
    # Lane-padded per-row bf16 payload + f32 output element.
    row_bytes = 2 * (_round_up(Dq, 128) + _round_up(Dr, 128)) + 4
    TB = _choose_batch_tile(B, row_bytes)
    B_pad = _round_up(B, TB)
    pad = B_pad - B
    if pad:
        q_stream = jnp.pad(q_stream, ((0, pad), (0, 0)))
        r_stream = jnp.pad(r_stream, ((0, pad), (0, 0)))
    G = B_pad // TB

    score = pl.pallas_call(
        _relation_kernel,
        out_shape=jax.ShapeDtypeStruct((1, B_pad), jnp.float32),
        grid_spec=pltpu.PrefetchScalarGridSpec(
            num_scalar_prefetch=0,
            grid=(G,),
            in_specs=[
                pl.BlockSpec((TB, Dq), lambda i: (i, 0)),   # question stream (tokens ++ ent)
                pl.BlockSpec((TB, Dr), lambda i: (i, 0)),   # relation stream (tokens ++ rel_emb)
                pl.BlockSpec((Dq, H), lambda i: (0, 0)),    # Wq (pool-folded, grid-invariant)
                pl.BlockSpec((Dr, H), lambda i: (0, 0)),    # Wr (pool-folded, grid-invariant)
            ],
            out_specs=pl.BlockSpec((1, TB), lambda i: (0, i)),
        ),
        compiler_params=pltpu.CompilerParams(
            dimension_semantics=("parallel",),
            vmem_limit_bytes=32 << 20),
    )(q_stream, r_stream, wq_all, wr_all)

    return score[0, :B]   # [B], matching F.cosine_similarity(q_emb, r_emb)


def _reference_forward(params, words, chars, entities, r_words, rel_emb, mask):
    """Pure-JAX f32 reference of the same forward pass (for a sanity check)."""
    q_tok = params["word_table"][words] + jnp.mean(params["char_table"][chars], axis=2)
    m = mask.astype(jnp.float32)
    q_pool = jnp.sum(q_tok * m[:, :, None], axis=1) / jnp.maximum(
        jnp.sum(m, axis=1, keepdims=True), 1.0)
    q_emb = (q_pool + params["ent_table"][entities]) @ params["wq"]
    r_pool = jnp.mean(params["word_table"][r_words], axis=1)
    r_emb = (r_pool + rel_emb) @ params["wr"]
    eps = 1e-8
    num = jnp.sum(q_emb * r_emb, axis=1)
    den = (jnp.maximum(jnp.sqrt(jnp.sum(q_emb * q_emb, axis=1)), eps)
           * jnp.maximum(jnp.sqrt(jnp.sum(r_emb * r_emb, axis=1)), eps))
    return num / den


def init_params(key, vocab_words=64, vocab_chars=32, vocab_ents=16, E=32, H=32):
    ks = jax.random.split(key, 5)
    return {
        "word_table": jax.random.normal(ks[0], (vocab_words, E), jnp.float32) * 0.1,
        "char_table": jax.random.normal(ks[1], (vocab_chars, E), jnp.float32) * 0.1,
        "ent_table":  jax.random.normal(ks[2], (vocab_ents, E), jnp.float32) * 0.1,
        "wq": jax.random.normal(ks[3], (E, H), jnp.float32) * (1.0 / jnp.sqrt(E)),
        "wr": jax.random.normal(ks[4], (E, H), jnp.float32) * (1.0 / jnp.sqrt(E)),
    }


if __name__ == "__main__":
    key = jax.random.PRNGKey(0)
    kp, kw, kc, ke, kr, km, kre = jax.random.split(key, 7)

    B, Lq, Lr, C, E, H = 2, 8, 4, 5, 32, 32
    params = init_params(kp, E=E, H=H)

    words = jax.random.randint(kw, (B, Lq), 0, 64, dtype=jnp.int32)
    chars = jax.random.randint(kc, (B, Lq, C), 0, 32, dtype=jnp.int32)
    entities = jax.random.randint(ke, (B,), 0, 16, dtype=jnp.int32)
    r_words = jax.random.randint(kr, (B, Lr), 0, 64, dtype=jnp.int32)
    rel_emb = jax.random.normal(kre, (B, E), jnp.float32) * 0.1
    # Mask: first row fully valid, second row has 5 valid tokens.
    mask = jnp.stack([jnp.ones((Lq,), jnp.float32),
                      (jnp.arange(Lq) < 5).astype(jnp.float32)], axis=0)

    fwd = jax.jit(functools.partial(relation_model_forward, params),
                  static_argnames=("method", "predict"))
    score = fwd(words, chars, entities, r_words, rel_emb,
                method="train", mask=mask, predict=False)
    jax.block_until_ready(score)

    assert score.shape == (B,)
    assert bool(jnp.all(jnp.isfinite(score)))
    ref = _reference_forward(params, words, chars, entities, r_words, rel_emb, mask)
    assert float(jnp.max(jnp.abs(score - ref))) < 5e-2, (score, ref)
    print("KERNEL_OK")
</pallas_src>

<mosaic_0001>
module attributes {stable_mosaic.version = 11 : i64} {
  func.func @_relation_kernel(%arg0: i32, %arg1: memref<128x288xbf16, #tpu.memory_space<vmem>>, %arg2: memref<128x160xbf16, #tpu.memory_space<vmem>>, %arg3: memref<288x32xbf16, #tpu.memory_space<vmem>>, %arg4: memref<160x32xbf16, #tpu.memory_space<vmem>>, %arg5: memref<1x128xf32, #tpu.memory_space<vmem>>) attributes {dimension_semantics = [#tpu.dimension_semantics<parallel>], iteration_bounds = array<i64: 1>, scalar_prefetch = 0 : i64, scratch_operands = 0 : i64, tpu.core_type = #tpu.core_type<tc>, window_params = [{transform_indices = @transform_0, window_bounds = array<i64: 128, 288>}, {transform_indices = @transform_1, window_bounds = array<i64: 128, 160>}, {pipeline_mode = #tpu.pipeline_mode<synchronous>, transform_indices = @transform_2, window_bounds = array<i64: 288, 32>}, {pipeline_mode = #tpu.pipeline_mode<synchronous>, transform_indices = @transform_3, window_bounds = array<i64: 160, 32>}, {transform_indices = @transform_4, window_bounds = array<i64: 1, 128>}]} {
    %c0 = arith.constant 0 : index
    %c0_0 = arith.constant 0 : index
    %0 = vector.load %arg1[%c0, %c0_0] : memref<128x288xbf16, #tpu.memory_space<vmem>>, vector<128x288xbf16>
    %c0_1 = arith.constant 0 : index
    %c0_2 = arith.constant 0 : index
    %1 = vector.load %arg3[%c0_1, %c0_2] : memref<288x32xbf16, #tpu.memory_space<vmem>>, vector<288x32xbf16>
    %cst = arith.constant dense<0.000000e+00> : vector<128x32xf32>
    %2 = tpu.matmul %0, %1, %cst {dimension_numbers = #tpu.dot_dimension_numbers<[1], [0], [0], [1], [0, 0, 1, 1], [], []>} : vector<128x288xbf16>, vector<288x32xbf16>, vector<128x32xf32> -> vector<128x32xf32>
    %c0_3 = arith.constant 0 : index
    %c0_4 = arith.constant 0 : index
    %3 = vector.load %arg2[%c0_3, %c0_4] : memref<128x160xbf16, #tpu.memory_space<vmem>>, vector<128x160xbf16>
    %c0_5 = arith.constant 0 : index
    %c0_6 = arith.constant 0 : index
    %4 = vector.load %arg4[%c0_5, %c0_6] : memref<160x32xbf16, #tpu.memory_space<vmem>>, vector<160x32xbf16>
    %cst_7 = arith.constant dense<0.000000e+00> : vector<128x32xf32>
    %5 = tpu.matmul %3, %4, %cst_7 {dimension_numbers = #tpu.dot_dimension_numbers<[1], [0], [0], [1], [0, 0, 1, 1], [], []>} : vector<128x160xbf16>, vector<160x32xbf16>, vector<128x32xf32> -> vector<128x32xf32>
    %cst_8 = arith.constant 1.000000e+00 : f32
    %6 = vector.broadcast %cst_8 : f32 to vector<1x32xf32>
    %7 = arith.mulf %2, %5 : vector<128x32xf32>
    %cst_9 = arith.constant dense<0.000000e+00> : vector<1x128xf32>
    %8 = tpu.matmul %6, %7, %cst_9 {dimension_numbers = #tpu.dot_dimension_numbers<[1], [1], [0], [0], [0, 0, 1, 0], [], []>} : vector<1x32xf32>, vector<128x32xf32>, vector<1x128xf32> -> vector<1x128xf32>
    %9 = arith.mulf %2, %2 : vector<128x32xf32>
    %cst_10 = arith.constant dense<0.000000e+00> : vector<1x128xf32>
    %10 = tpu.matmul %6, %9, %cst_10 {dimension_numbers = #tpu.dot_dimension_numbers<[1], [1], [0], [0], [0, 0, 1, 0], [], []>} : vector<1x32xf32>, vector<128x32xf32>, vector<1x128xf32> -> vector<1x128xf32>
    %11 = arith.mulf %5, %5 : vector<128x32xf32>
    %cst_11 = arith.constant dense<0.000000e+00> : vector<1x128xf32>
    %12 = tpu.matmul %6, %11, %cst_11 {dimension_numbers = #tpu.dot_dimension_numbers<[1], [1], [0], [0], [0, 0, 1, 0], [], []>} : vector<1x32xf32>, vector<128x32xf32>, vector<1x128xf32> -> vector<1x128xf32>
    %cst_12 = arith.constant 1.000000e-16 : f32
    %13 = vector.broadcast %cst_12 : f32 to vector<1x128xf32>
    %14 = arith.maximumf %10, %13 : vector<1x128xf32>
    %15 = math.rsqrt %14 : vector<1x128xf32>
    %16 = arith.mulf %8, %15 : vector<1x128xf32>
    %cst_13 = arith.constant 1.000000e-16 : f32
    %17 = vector.broadcast %cst_13 : f32 to vector<1x128xf32>
    %18 = arith.maximumf %12, %17 : vector<1x128xf32>
    %19 = math.rsqrt %18 : vector<1x128xf32>
    %20 = arith.mulf %16, %19 : vector<1x128xf32>
    %c0_14 = arith.constant 0 : index
    %c0_15 = arith.constant 0 : index
    %21 = vector.load %arg5[%c0_14, %c0_15] : memref<1x128xf32, #tpu.memory_space<vmem>>, vector<1x128xf32>
    tpu.vector_store %arg5[%c0_14, %c0_15], %20 {strides = array<i32>} : memref<1x128xf32, #tpu.memory_space<vmem>>, vector<1x128xf32>,
    return
  }
  func.func @transform_0(%arg0: i32) -> (i32, i32) {
    %c0_i32 = arith.constant 0 : i32
    %c0_i32_0 = arith.constant 0 : i32
    return %arg0, %c0_i32 : i32, i32
  }
  func.func @transform_1(%arg0: i32) -> (i32, i32) {
    %c0_i32 = arith.constant 0 : i32
    %c0_i32_0 = arith.constant 0 : i32
    return %arg0, %c0_i32 : i32, i32
  }
  func.func @transform_2(%arg0: i32) -> (i32, i32) {
    %c0_i32 = arith.constant 0 : i32
    %c0_i32_0 = arith.constant 0 : i32
    %c0_i32_1 = arith.constant 0 : i32
    return %c0_i32, %c0_i32_0 : i32, i32
  }
  func.func @transform_3(%arg0: i32) -> (i32, i32) {
    %c0_i32 = arith.constant 0 : i32
    %c0_i32_0 = arith.constant 0 : i32
    %c0_i32_1 = arith.constant 0 : i32
    return %c0_i32, %c0_i32_0 : i32, i32
  }
  func.func @transform_4(%arg0: i32) -> (i32, i32) {
    %c0_i32 = arith.constant 0 : i32
    %c0_i32_0 = arith.constant 0 : i32
    return %c0_i32, %arg0 : i32, i32
  }
}

</mosaic_0001>

<bundles_post_ra>
// kernel: tile.1
= control target key start
LH: loop header
LB: loop body
LE: loop exit
PB: predicated region body
PF: predicated region fallthrough
CT: control target
= control target key end

     0   :  { %vm603_vm0 = vcmask 1047556   ;;  %vm514_vm1 = vcmask 261120   ;;  %s1156_s9 = smov 64   ;;  %s1157_s10 = smov 32   ;;  %vm607_vm2 = vcmask 1048320   ;;  %vm694_vm3 = vcmask 785920   ;;  %s1320_s0 = inlined_call_operand.vmem [shape: bf16[8,32,32], index: 0, kind: input, shape index: {}]   ;;  %s1321_s1 = inlined_call_operand.vmem [shape: bf16[256,32], index: 1, kind: output, shape index: {}]  }
   0x1   :  { %v1078_v0 = vld [vmem:[%s1320_s0 + $0x58] sm:$0xff]   ;;  %v1079_v1 = vld [vmem:[%s1320_s0 + $0x50] sm:$0xff]   ;;  %v1080_v2 = vld [vmem:[%s1320_s0 + $0x48] sm:$0xff]   ;;  %vm781_vm4 = vcmask 523520  }
   0x2   :  { %v1008_v3 = vunpack.c.l.bf16 %v1078_v0  ;;  %v1009_v4 = vunpack.c.h.bf16 %v1078_v0  ;;  %v1012_v5 = vunpack.c.l.bf16 %v1079_v1  ;;  %v1013_v6 = vunpack.c.h.bf16 %v1079_v1  ;;  %v1081_v7 = vld [vmem:[%s1320_s0 + $0x40] sm:$0xff]   ;;  %v1086_v8 = vld [vmem:[%s1320_s0 + $0x18] sm:$0xff]   ;;  %v1087_v9 = vld [vmem:[%s1320_s0 + $0x10] sm:$0xff]  }
   0x3   :  { %v1016_v10 = vunpack.c.l.bf16 %v1080_v2  ;;  %v1017_v11 = vunpack.c.h.bf16 %v1080_v2  ;;  %v1020_v12 = vunpack.c.l.bf16 %v1081_v7  ;;  %v1021_v13 = vunpack.c.h.bf16 %v1081_v7  ;;  %v1088_v14 = vld [vmem:[%s1320_s0 + $0x8] sm:$0xff]   ;;  %v1051_v15 = vld [vmem:[%s1320_s0] sm:$0xff]   ;;  %v1074_v16 = vld [vmem:[%s1320_s0 + $0x78] sm:$0xff]  }
   0x4   :  { %148 = vst [vmem:[#allocation1 + $0xb8] sm:$0xff] %v1009_v4  ;;  %164 = vst [vmem:[#allocation1 + $0xb0] sm:$0xff] %v1008_v3  ;;  %v1040_v17 = vunpack.c.l.bf16 %v1086_v8  ;;  %v1041_v18 = vunpack.c.h.bf16 %v1086_v8  ;;  %v1044_v19 = vunpack.c.l.bf16 %v1087_v9  ;;  %v1045_v20 = vunpack.c.h.bf16 %v1087_v9  ;;  %v1075_v21 = vld [vmem:[%s1320_s0 + $0x70] sm:$0xff]   ;;  %v1076_v22 = vld [vmem:[%s1320_s0 + $0x68] sm:$0xff]  }
   0x5   :  { %180 = vst [vmem:[#allocation1 + $0xa8] sm:$0xff] %v1013_v6  ;;  %196 = vst [vmem:[#allocation1 + $0xa0] sm:$0xff] %v1012_v5  ;;  %v1077_v23 = vld [vmem:[%s1320_s0 + $0x60] sm:$0xff]   ;;  %v1048_v24 = vunpack.c.l.bf16 %v1088_v14  ;;  %v1049_v25 = vunpack.c.h.bf16 %v1088_v14  ;;  %v1052_v26 = vunpack.c.l.bf16 %v1051_v15  ;;  %v1053_v27 = vunpack.c.h.bf16 %v1051_v15  ;;  %v1082_v28 = vld [vmem:[%s1320_s0 + $0x38] sm:$0xff]  }
   0x6   :  { %212 = vst [vmem:[#allocation1 + $0x98] sm:$0xff] %v1017_v11  ;;  %228 = vst [vmem:[#allocation1 + $0x90] sm:$0xff] %v1016_v10  ;;  %v1083_v29 = vld [vmem:[%s1320_s0 + $0x30] sm:$0xff]   ;;  %v992_v30 = vunpack.c.l.bf16 %v1074_v16  ;;  %v993_v31 = vunpack.c.h.bf16 %v1074_v16  ;;  %v996_v32 = vunpack.c.l.bf16 %v1075_v21  ;;  %v997_v33 = vunpack.c.h.bf16 %v1075_v21  ;;  %v1084_v34 = vld [vmem:[%s1320_s0 + $0x28] sm:$0xff]  }
   0x7   :  { %244 = vst [vmem:[#allocation1 + $0x88] sm:$0xff] %v1021_v13  ;;  %260 = vst [vmem:[#allocation1 + $0x80] sm:$0xff] %v1020_v12  ;;  %v1085_v35 = vld [vmem:[%s1320_s0 + $0x20] sm:$0xff]   ;;  %v1000_v36 = vunpack.c.l.bf16 %v1076_v22  ;;  %v1001_v37 = vunpack.c.h.bf16 %v1076_v22  ;;  %v1004_v38 = vunpack.c.l.bf16 %v1077_v23  ;;  %v1005_v39 = vunpack.c.h.bf16 %v1077_v23  ;;  %s1155_s0 = smov 96  }
   0x8   :  { %404 = vst [vmem:[#allocation1 + $0x38] sm:$0xff] %v1041_v18  ;;  %420 = vst [vmem:[#allocation1 + $0x30] sm:$0xff] %v1040_v17  ;;  %v1024_v40 = vunpack.c.l.bf16 %v1082_v28  ;;  %v1025_v41 = vunpack.c.h.bf16 %v1082_v28  ;;  %v1028_v42 = vunpack.c.l.bf16 %v1083_v29  ;;  %v1029_v43 = vunpack.c.h.bf16 %v1083_v29 }
   0x9   :  { %436 = vst [vmem:[#allocation1 + $0x28] sm:$0xff] %v1045_v20  ;;  %452 = vst [vmem:[#allocation1 + $0x20] sm:$0xff] %v1044_v19  ;;  %v1032_v44 = vunpack.c.l.bf16 %v1084_v34  ;;  %v1033_v45 = vunpack.c.h.bf16 %v1084_v34  ;;  %v1036_v46 = vunpack.c.l.bf16 %v1085_v35  ;;  %v1037_v47 = vunpack.c.h.bf16 %v1085_v35 }
   0xa   :  { %468 = vst [vmem:[#allocation1 + $0x18] sm:$0xff] %v1049_v25  ;;  %484 = vst [vmem:[#allocation1 + $0x10] sm:$0xff] %v1048_v24 }
   0xb   :  { %499 = vst [vmem:[#allocation1 + $0x8] sm:$0xff] %v1053_v27  ;;  %512 = vst [vmem:[#allocation1] sm:$0xff] %v1052_v26 }
   0xc   :  { %20 = vst [vmem:[#allocation1 + $0xf8] sm:$0xff] %v993_v31  ;;  %36 = vst [vmem:[#allocation1 + $0xf0] sm:$0xff] %v992_v30  ;;  %v612_v48 = vld [vmem:[#allocation1 + $0x83] ss:$8 sm:$0xf0]  }
   0xd   :  { %52 = vst [vmem:[#allocation1 + $0xe8] sm:$0xff] %v997_v33  ;;  %68 = vst [vmem:[#allocation1 + $0xe0] sm:$0xff] %v996_v32  ;;  %v634_v49 = vld [vmem:[#allocation1 + $0x87] ss:$8 sm:$0xf0]  }
   0xe   :  { %84 = vst [vmem:[#allocation1 + $0xd8] sm:$0xff] %v1001_v37  ;;  %100 = vst [vmem:[#allocation1 + $0xd0] sm:$0xff] %v1000_v36  ;;  %v610_v50 = vld [vmem:[#allocation1 + $0x83] ss:$8 sm:$0xf]  }
   0xf   :  { %116 = vst [vmem:[#allocation1 + $0xc8] sm:$0xff] %v1005_v39  ;;  %132 = vst [vmem:[#allocation1 + $0xc0] sm:$0xff] %v1004_v38  ;;  %v632_v51 = vld [vmem:[#allocation1 + $0x87] ss:$8 sm:$0xf]   ;;  %v614_v53 = vsel %vm603_vm0, %v612_v48, %v610_v50 }
  0x10   :  { %276 = vst [vmem:[#allocation1 + $0x78] sm:$0xff] %v1025_v41  ;;  %292 = vst [vmem:[#allocation1 + $0x70] sm:$0xff] %v1024_v40  ;;  %v602_v52 = vld [vmem:[#allocation1 + $0x3] ss:$8 sm:$0xf0]   ;;  %v636_v60 = vsel %vm603_vm0, %v634_v49, %v632_v51 }
  0x11   :  { %308 = vst [vmem:[#allocation1 + $0x68] sm:$0xff] %v1029_v43  ;;  %324 = vst [vmem:[#allocation1 + $0x60] sm:$0xff] %v1028_v42  ;;  %v623_v54 = vld [vmem:[#allocation1 + $0x7] ss:$8 sm:$0xf0]  }
  0x12   :  { %340 = vst [vmem:[#allocation1 + $0x58] sm:$0xff] %v1033_v45  ;;  %356 = vst [vmem:[#allocation1 + $0x50] sm:$0xff] %v1032_v44  ;;  %v600_v55 = vld [vmem:[#allocation1 + $0x3] ss:$8 sm:$0xf]  }
  0x13   :  { %372 = vst [vmem:[#allocation1 + $0x48] sm:$0xff] %v1037_v47  ;;  %388 = vst [vmem:[#allocation1 + $0x40] sm:$0xff] %v1036_v46  ;;  %v621_v56 = vld [vmem:[#allocation1 + $0x7] ss:$8 sm:$0xf]   ;;  %v604_v57 = vsel %vm603_vm0, %v602_v52, %v600_v55 }
  0x14   :  { %v656_v58 = vld [vmem:[#allocation1 + $0xc3] ss:$8 sm:$0xf0]   ;;  %v625_v59 = vsel %vm603_vm0, %v623_v54, %v621_v56  ;;  %v678_v61 = vld [vmem:[#allocation1 + $0xc7] ss:$8 sm:$0xf0]   ;;  %v1095_v62 = vpack.i.bf16 %v614_v53, %v604_v57 }
  0x15   :  { %v1100_v5 = vpack.i.bf16 %v636_v60, %v625_v59  ;;  %v687_v10 = vld [vmem:[#allocation1 + $0x2] ss:$8 sm:$0xf]   ;;  %v708_v17 = vld [vmem:[#allocation1 + $0x6] ss:$8 sm:$0xf]  }
  0x16   :  { %v654_v63 = vld [vmem:[#allocation1 + $0xc3] ss:$8 sm:$0xf]   ;;  %v676_v0 = vld [vmem:[#allocation1 + $0xc7] ss:$8 sm:$0xf]   ;;  %1096 = vrot.lane.b32.xlu0 %v1095_v62, %s1155_s0 }
  0x17   :  { %v658_v2 = vsel %vm603_vm0, %v656_v58, %v654_v63  ;;  %v680_v9 = vsel %vm603_vm0, %v678_v61, %v676_v0  ;;  %v689_v11 = vld [vmem:[#allocation1 + $0x2] ss:$8 sm:$0xf0]   ;;  %v710_v18 = vld [vmem:[#allocation1 + $0x6] ss:$8 sm:$0xf0]  }
  0x18   :  { %v645_v1 = vld [vmem:[#allocation1 + $0x43] ss:$8 sm:$0xf0]   ;;  %v667_v3 = vld [vmem:[#allocation1 + $0x47] ss:$8 sm:$0xf0]   ;;  %v691_v13 = vsel %vm603_vm0, %v689_v11, %v687_v10  ;;  %v712_v23 = vsel %vm603_vm0, %v710_v18, %v708_v17 }
  0x19   :  { %v697_v14 = vld [vmem:[#allocation1 + $0x82] ss:$8 sm:$0xf]   ;;  %v719_v21 = vld [vmem:[#allocation1 + $0x86] ss:$8 sm:$0xf]  }
  0x1a   :  { %v643_v4 = vld [vmem:[#allocation1 + $0x43] ss:$8 sm:$0xf]   ;;  %v665_v6 = vld [vmem:[#allocation1 + $0x47] ss:$8 sm:$0xf]   ;;  %1101 = vrot.lane.b32.xlu0 %v1100_v5, %s1155_s0 }
  0x1b   :  { %v647_v7 = vsel %vm603_vm0, %v645_v1, %v643_v4  ;;  %v669_v8 = vsel %vm603_vm0, %v667_v3, %v665_v6  ;;  %v699_v15 = vld [vmem:[#allocation1 + $0x82] ss:$8 sm:$0xf0]   ;;  %v721_v22 = vld [vmem:[#allocation1 + $0x86] ss:$8 sm:$0xf0]  }
  0x1c   :  { %v1105_v12 = vpack.i.bf16 %v658_v2, %v647_v7  ;;  %v701_v16 = vsel %vm603_vm0, %v699_v15, %v697_v14  ;;  %v1110_v19 = vpack.i.bf16 %v680_v9, %v669_v8  ;;  %v723_v24 = vsel %vm603_vm0, %v721_v22, %v719_v21  ;;  %v730_v25 = vld [vmem:[#allocation1 + $0x42] ss:$8 sm:$0xf]   ;;  %v752_v31 = vld [vmem:[#allocation1 + $0x46] ss:$8 sm:$0xf]  }
  0x1d   :  { %v1115_v20 = vpack.i.bf16 %v701_v16, %v691_v13  ;;  %v732_v26 = vld [vmem:[#allocation1 + $0x42] ss:$8 sm:$0xf0]   ;;  %v754_v32 = vld [vmem:[#allocation1 + $0x46] ss:$8 sm:$0xf0]   ;;  %v1120_v33 = vpack.i.bf16 %v723_v24, %v712_v23 }
  0x1e   :  { %1106 = vrot.lane.b32.xlu1 %v1105_v12, %s1155_s0  ;;  %v734_v27 = vsel %vm603_vm0, %v732_v26, %v730_v25  ;;  %v741_v28 = vld [vmem:[#allocation1 + $0xc2] ss:$8 sm:$0xf]   ;;  %v763_v35 = vld [vmem:[#allocation1 + $0xc6] ss:$8 sm:$0xf]   ;;  %v756_v37 = vsel %vm603_vm0, %v754_v32, %v752_v31 }
  0x1f   :  { %v743_v29 = vld [vmem:[#allocation1 + $0xc2] ss:$8 sm:$0xf0]   ;;  %1116 = vrot.lane.b32.xlu0 %v1115_v20, %s1156_s9  ;;  %v765_v36 = vld [vmem:[#allocation1 + $0xc6] ss:$8 sm:$0xf0]  }
  0x20   :  { %v745_v30 = vsel %vm603_vm0, %v743_v29, %v741_v28  ;;  %v767_v38 = vsel %vm603_vm0, %v765_v36, %v763_v35  ;;  %v774_v39 = vld [vmem:[#allocation1 + $0x1] ss:$8 sm:$0xf]   ;;  %v795_v45 = vld [vmem:[#allocation1 + $0x5] ss:$8 sm:$0xf]  }
  0x21   :  { %v1125_v34 = vpack.i.bf16 %v745_v30, %v734_v27  ;;  %v776_v40 = vld [vmem:[#allocation1 + $0x1] ss:$8 sm:$0xf0]   ;;  %v797_v46 = vld [vmem:[#allocation1 + $0x5] ss:$8 sm:$0xf0]   ;;  %v1130_v47 = vpack.i.bf16 %v767_v38, %v756_v37 }
  0x22   :  { %1111 = vrot.lane.b32.xlu1 %v1110_v19, %s1155_s0  ;;  %v778_v41 = vsel %vm603_vm0, %v776_v40, %v774_v39  ;;  %v784_v42 = vld [vmem:[#allocation1 + $0x81] ss:$8 sm:$0xf]   ;;  %v806_v49 = vld [vmem:[#allocation1 + $0x85] ss:$8 sm:$0xf]   ;;  %v799_v51 = vsel %vm603_vm0, %v797_v46, %v795_v45 }
  0x23   :  { %v786_v43 = vld [vmem:[#allocation1 + $0x81] ss:$8 sm:$0xf0]   ;;  %1126 = vrot.lane.b32.xlu0 %v1125_v34, %s1156_s9  ;;  %v808_v50 = vld [vmem:[#allocation1 + $0x85] ss:$8 sm:$0xf0]  }
  0x24   :  { %v788_v44 = vsel %vm603_vm0, %v786_v43, %v784_v42  ;;  %v810_v52 = vsel %vm603_vm0, %v808_v50, %v806_v49  ;;  %v817_v53 = vld [vmem:[#allocation1 + $0x41] ss:$8 sm:$0xf]   ;;  %v839_v59 = vld [vmem:[#allocation1 + $0x45] ss:$8 sm:$0xf]  }
  0x25   :  { %v1135_v48 = vpack.i.bf16 %v788_v44, %v778_v41  ;;  %v819_v54 = vld [vmem:[#allocation1 + $0x41] ss:$8 sm:$0xf0]   ;;  %v841_v60 = vld [vmem:[#allocation1 + $0x45] ss:$8 sm:$0xf0]   ;;  %v1140_v61 = vpack.i.bf16 %v810_v52, %v799_v51 }
  0x26   :  { %1121 = vrot.lane.b32.xlu1 %v1120_v33, %s1156_s9  ;;  %v821_v55 = vsel %vm603_vm0, %v819_v54, %v817_v53  ;;  %v828_v56 = vld [vmem:[#allocation1 + $0xc1] ss:$8 sm:$0xf]   ;;  %v850_v63 = vld [vmem:[#allocation1 + $0xc5] ss:$8 sm:$0xf]   ;;  %v843_v1 = vsel %vm603_vm0, %v841_v60, %v839_v59 }
  0x27   :  { %v830_v57 = vld [vmem:[#allocation1 + $0xc1] ss:$8 sm:$0xf0]   ;;  %1136 = vrot.lane.b32.xlu0 %v1135_v48, %s1157_s10  ;;  %v852_v0 = vld [vmem:[#allocation1 + $0xc5] ss:$8 sm:$0xf0]  }
  0x28   :  { %v832_v58 = vsel %vm603_vm0, %v830_v57, %v828_v56  ;;  %v854_v2 = vsel %vm603_vm0, %v852_v0, %v850_v63  ;;  %v513_v3 = vld [vmem:[#allocation1] ss:$4 sm:$0xff]  }
  0x29   :  { %v1145_v62 = vpack.i.bf16 %v832_v58, %v821_v55  ;;  %v523_v4 = vld [vmem:[#allocation1 + $0x20] ss:$4 sm:$0xff]   ;;  %515 = vst.msk [vmem:[#allocation0] ss:$8 sm:$0x3] %vm514_vm1, %v513_v3   ;;  %v1150_v11 = vpack.i.bf16 %v854_v2, %v843_v1 }
  0x2a   :  { %1131 = vrot.lane.b32.xlu1 %v1130_v47, %s1156_s9  ;;  %v556_v5 = vld [vmem:[#allocation1 + $0x80] ss:$4 sm:$0xff]   ;;  %517 = vst.msk [vmem:[#allocation0 - $0xf] ss:$8 sm:$0xc] %vm514_vm1, %v513_v3  }
  0x2b   :  { %519 = vst.msk [vmem:[#allocation0 - $0x1e] ss:$8 sm:$0x30] %vm514_vm1, %v513_v3   ;;  %521 = vst.msk [vmem:[#allocation0 - $0x2d] ss:$8 sm:$0xc0] %vm514_vm1, %v513_v3   ;;  %1146 = vrot.lane.b32.xlu0 %v1145_v62, %s1157_s10 }
  0x2c   :  { %526 = vst.msk [vmem:[#allocation0 + $0x4] ss:$8 sm:$0x3] %vm514_vm1, %v523_v4   ;;  %528 = vst.msk [vmem:[#allocation0 - $0xb] ss:$8 sm:$0xc] %vm514_vm1, %v523_v4  }
  0x2d   :  { %530 = vst.msk [vmem:[#allocation0 - $0x1a] ss:$8 sm:$0x30] %vm514_vm1, %v523_v4   ;;  %532 = vst.msk [vmem:[#allocation0 - $0x29] ss:$8 sm:$0xc0] %vm514_vm1, %v523_v4  }
  0x2e   :  { %559 = vst.msk [vmem:[#allocation0 + $0x20] ss:$8 sm:$0x3] %vm514_vm1, %v556_v5   ;;  %561 = vst.msk [vmem:[#allocation0 + $0x11] ss:$8 sm:$0xc] %vm514_vm1, %v556_v5   ;;  %1141 = vrot.lane.b32.xlu1 %v1140_v61, %s1157_s10 }
  0x2f   :  { %563 = vst.msk [vmem:[#allocation0 + $0x2] ss:$8 sm:$0x30] %vm514_vm1, %v556_v5   ;;  %565 = vst.msk [vmem:[#allocation0 - $0xd] ss:$8 sm:$0xc0] %vm514_vm1, %v556_v5  }
  0x30   :  { %v567_v6 = vld [vmem:[#allocation1 + $0xa0] ss:$4 sm:$0xff]  }
  0x31   :  { %v534_v7 = vld [vmem:[#allocation1 + $0x40] ss:$4 sm:$0xff]   ;;  %570 = vst.msk [vmem:[#allocation0 + $0x24] ss:$8 sm:$0x3] %vm514_vm1, %v567_v6  }
  0x32   :  { %572 = vst.msk [vmem:[#allocation0 + $0x15] ss:$8 sm:$0xc] %vm514_vm1, %v567_v6   ;;  %574 = vst.msk [vmem:[#allocation0 + $0x6] ss:$8 sm:$0x30] %vm514_vm1, %v567_v6   ;;  %1151 = vrot.lane.b32.xlu1 %v1150_v11, %s1157_s10 }
  0x33   :  { %576 = vst.msk [vmem:[#allocation0 - $0x9] ss:$8 sm:$0xc0] %vm514_vm1, %v567_v6   ;;  %537 = vst.msk [vmem:[#allocation0 + $0x10] ss:$8 sm:$0x3] %vm514_vm1, %v534_v7  }
  0x34   :  { %539 = vst.msk [vmem:[#allocation0 + $0x1] ss:$8 sm:$0xc] %vm514_vm1, %v534_v7   ;;  %541 = vst.msk [vmem:[#allocation0 - $0xe] ss:$8 sm:$0x30] %vm514_vm1, %v534_v7  }
  0x35   :  { %543 = vst.msk [vmem:[#allocation0 - $0x1d] ss:$8 sm:$0xc0] %vm514_vm1, %v534_v7   ;;  %v545_v8 = vld [vmem:[#allocation1 + $0x60] ss:$4 sm:$0xff]  }
  0x36   :  { %v578_v9 = vld [vmem:[#allocation1 + $0xc0] ss:$4 sm:$0xff]   ;;  %548 = vst.msk [vmem:[#allocation0 + $0x14] ss:$8 sm:$0x3] %vm514_vm1, %v545_v8  }
  0x37   :  { %v589_v10 = vld [vmem:[#allocation1 + $0xe0] ss:$4 sm:$0xff]   ;;  %550 = vst.msk [vmem:[#allocation0 + $0x5] ss:$8 sm:$0xc] %vm514_vm1, %v545_v8  }
  0x38   :  { %552 = vst.msk [vmem:[#allocation0 - $0xa] ss:$8 sm:$0x30] %vm514_vm1, %v545_v8   ;;  %554 = vst.msk [vmem:[#allocation0 - $0x19] ss:$8 sm:$0xc0] %vm514_vm1, %v545_v8  }
  0x39   :  { %581 = vst.msk [vmem:[#allocation0 + $0x30] ss:$8 sm:$0x3] %vm514_vm1, %v578_v9   ;;  %583 = vst.msk [vmem:[#allocation0 + $0x21] ss:$8 sm:$0xc] %vm514_vm1, %v578_v9  }
  0x3a   :  { %585 = vst.msk [vmem:[#allocation0 + $0x12] ss:$8 sm:$0x30] %vm514_vm1, %v578_v9   ;;  %587 = vst.msk [vmem:[#allocation0 + $0x3] ss:$8 sm:$0xc0] %vm514_vm1, %v578_v9  }
  0x3b   :  { %592 = vst.msk [vmem:[#allocation0 + $0x34] ss:$8 sm:$0x3] %vm514_vm1, %v589_v10   ;;  %594 = vst.msk [vmem:[#allocation0 + $0x25] ss:$8 sm:$0xc] %vm514_vm1, %v589_v10  }
  0x3c   :  { %596 = vst.msk [vmem:[#allocation0 + $0x16] ss:$8 sm:$0x30] %vm514_vm1, %v589_v10   ;;  %598 = vst.msk [vmem:[#allocation0 + $0x7] ss:$8 sm:$0xc0] %vm514_vm1, %v589_v10  }
  0x88   :  { %v1097_v12 = vpop.permute.xlu0 %1096 }
  0x89   :  { %v1099_v13 = vunpack.i.h.bf16 %v1097_v12  ;;  %v1098_v14 = vunpack.i.l.bf16 %v1097_v12 }
  0x8b   :  { %608 = vst.msk [vmem:[#allocation0] sm:$0xff] %vm607_vm2, %v1098_v14   ;;  %619 = vst.msk [vmem:[#allocation0 + $0x20] sm:$0xff] %vm607_vm2, %v1099_v13  }
  0x8c   :  { %v1102_v16 = vpop.permute.xlu0 %1101 }
  0x8d   :  { %v1104_v19 = vunpack.i.h.bf16 %v1102_v16  ;;  %v1103_v20 = vunpack.i.l.bf16 %v1102_v16 }
  0x8f   :  { %630 = vst.msk [vmem:[#allocation0 + $0x8] sm:$0xff] %vm607_vm2, %v1103_v20   ;;  %641 = vst.msk [vmem:[#allocation0 + $0x28] sm:$0xff] %vm607_vm2, %v1104_v19  }
  0x90   :  { %v1107_v15 = vpop.permute.xlu1 %1106 }
  0x91   :  { %v1109_v17 = vunpack.i.h.bf16 %v1107_v15  ;;  %v1108_v18 = vunpack.i.l.bf16 %v1107_v15  ;;  %v1117_v22 = vpop.permute.xlu0 %1116 }
  0x92   :  { %v1119_v25 = vunpack.i.h.bf16 %v1117_v22  ;;  %v1118_v26 = vunpack.i.l.bf16 %v1117_v22 }
  0x93   :  { %652 = vst.msk [vmem:[#allocation0 + $0x10] sm:$0xff] %vm607_vm2, %v1108_v18   ;;  %663 = vst.msk [vmem:[#allocation0 + $0x30] sm:$0xff] %vm607_vm2, %v1109_v17  }
  0x94   :  { %v1112_v21 = vpop.permute.xlu1 %1111  ;;  %695 = vst.msk [vmem:[#allocation0] sm:$0xff] %vm694_vm3, %v1118_v26   ;;  %706 = vst.msk [vmem:[#allocation0 + $0x20] sm:$0xff] %vm694_vm3, %v1119_v25  }
  0x95   :  { %v1114_v23 = vunpack.i.h.bf16 %v1112_v21  ;;  %v1113_v24 = vunpack.i.l.bf16 %v1112_v21  ;;  %v1127_v28 = vpop.permute.xlu0 %1126 }
  0x96   :  { %v1129_v31 = vunpack.i.h.bf16 %v1127_v28  ;;  %v1128_v32 = vunpack.i.l.bf16 %v1127_v28 }
  0x97   :  { %674 = vst.msk [vmem:[#allocation0 + $0x18] sm:$0xff] %vm607_vm2, %v1113_v24   ;;  %685 = vst.msk [vmem:[#allocation0 + $0x38] sm:$0xff] %vm607_vm2, %v1114_v23  }
  0x98   :  { %v1122_v27 = vpop.permute.xlu1 %1121  ;;  %739 = vst.msk [vmem:[#allocation0 + $0x10] sm:$0xff] %vm694_vm3, %v1128_v32   ;;  %750 = vst.msk [vmem:[#allocation0 + $0x30] sm:$0xff] %vm694_vm3, %v1129_v31  }
  0x99   :  { %v1124_v29 = vunpack.i.h.bf16 %v1122_v27  ;;  %v1123_v30 = vunpack.i.l.bf16 %v1122_v27  ;;  %v1137_v34 = vpop.permute.xlu0 %1136 }
  0x9a   :  { %v1139_v37 = vunpack.i.h.bf16 %v1137_v34  ;;  %v1138_v38 = vunpack.i.l.bf16 %v1137_v34 }
  0x9b   :  { %728 = vst.msk [vmem:[#allocation0 + $0x28] sm:$0xff] %vm694_vm3, %v1124_v29   ;;  %717 = vst.msk [vmem:[#allocation0 + $0x8] sm:$0xff] %vm694_vm3, %v1123_v30  }
  0x9c   :  { %v1132_v33 = vpop.permute.xlu1 %1131  ;;  %793 = vst.msk [vmem:[#allocation0 + $0x20] sm:$0xff] %vm781_vm4, %v1139_v37   ;;  %782 = vst.msk [vmem:[#allocation0] sm:$0xff] %vm781_vm4, %v1138_v38  }
  0x9d   :  { %v1134_v35 = vunpack.i.h.bf16 %v1132_v33  ;;  %v1133_v36 = vunpack.i.l.bf16 %v1132_v33  ;;  %v1147_v40 = vpop.permute.xlu0 %1146 }
  0x9e   :  { %v1149_v43 = vunpack.i.h.bf16 %v1147_v40  ;;  %v1148_v44 = vunpack.i.l.bf16 %v1147_v40 }
  0x9f   :  { %761 = vst.msk [vmem:[#allocation0 + $0x18] sm:$0xff] %vm694_vm3, %v1133_v36   ;;  %772 = vst.msk [vmem:[#allocation0 + $0x38] sm:$0xff] %vm694_vm3, %v1134_v35  }
  0xa0   :  { %v1142_v39 = vpop.permute.xlu1 %1141  ;;  %826 = vst.msk [vmem:[#allocation0 + $0x10] sm:$0xff] %vm781_vm4, %v1148_v44   ;;  %837 = vst.msk [vmem:[#allocation0 + $0x30] sm:$0xff] %vm781_vm4, %v1149_v43  }
  0xa1   :  { %v1144_v41 = vunpack.i.h.bf16 %v1142_v39  ;;  %v1143_v42 = vunpack.i.l.bf16 %v1142_v39 }
  0xa3   :  { %804 = vst.msk [vmem:[#allocation0 + $0x8] sm:$0xff] %vm781_vm4, %v1143_v42   ;;  %815 = vst.msk [vmem:[#allocation0 + $0x28] sm:$0xff] %vm781_vm4, %v1144_v41   ;;  %v889_v48 = vld [vmem:[#allocation0 + $0x20] sm:$0xff] }
  0xa4   :  { %v1152_v45 = vpop.permute.xlu1 %1151  ;;  %v864_v49 = vld [vmem:[#allocation0] sm:$0xff] }
  0xa5   :  { %v1154_v46 = vunpack.i.h.bf16 %v1152_v45  ;;  %v1153_v47 = vunpack.i.l.bf16 %v1152_v45 }
  0xa7   :  { %848 = vst.msk [vmem:[#allocation0 + $0x18] sm:$0xff] %vm781_vm4, %v1153_v47   ;;  %859 = vst.msk [vmem:[#allocation0 + $0x38] sm:$0xff] %vm781_vm4, %v1154_v46   ;;  %v875_v54 = vld [vmem:[#allocation0 + $0x10] sm:$0xff] }
  0xa8   :  { %v903_v55 = vld [vmem:[#allocation0 + $0x30] sm:$0xff] }
  0xaa   :  { %v869_v50 = vld [vmem:[#allocation0 + $0x8] sm:$0xff] }
  0xab   :  { %v896_v51 = vld [vmem:[#allocation0 + $0x28] sm:$0xff]  ;;  %v1057_v52 = vpack.c.bf16 %v869_v50, %v864_v49 }
  0xac   :  { %v1067_v53 = vpack.c.bf16 %v896_v51, %v889_v48 }
  0xad   :  { %1058 = vst [vmem:[%s1321_s1] sm:$0xff] %v1057_v52  }
  0xae   :  { %1090 = vst [vmem:[%s1321_s1 + $0x10] sm:$0xff] %v1067_v53   ;;  %v882_v56 = vld [vmem:[#allocation0 + $0x18] sm:$0xff] }
  0xaf   :  { %v910_v57 = vld [vmem:[#allocation0 + $0x38] sm:$0xff]  ;;  %v1062_v58 = vpack.c.bf16 %v882_v56, %v875_v54 }
  0xb0   :  { %v1072_v59 = vpack.c.bf16 %v910_v57, %v903_v55 }
  0xb1   :  { %1089 = vst [vmem:[%s1321_s1 + $0x8] sm:$0xff] %v1062_v58  }
  0xb2   :  { %1091 = vst [vmem:[%s1321_s1 + $0x18] sm:$0xff] %v1072_v59  }

// kernel: tile.0
= control target key start
LH: loop header
LB: loop body
LE: loop exit
PB: predicated region body
PF: predicated region fallthrough
CT: control target
= control target key end

     0   :  { %vm515_vm0 = vcmask 1047556   ;;  %vm517_vm1 = vcmask 261120   ;;  %s814_s24 = smov 96   ;;  %s815_s25 = smov 32   ;;  %vm597_vm2 = vcmask 785920   ;;  %vm554_vm3 = vcmask 1048320   ;;  %s887_s0 = inlined_call_operand.vmem [shape: bf16[4,32,32], index: 0, kind: input, shape index: {}]   ;;  %s888_s1 = inlined_call_operand.vmem [shape: bf16[128,32], index: 1, kind: output, shape index: {}]  }
   0x1   :  { %v751_v0 = vld [vmem:[%s887_s0 + $0x1a] sm:$0xff]   ;;  %v754_v1 = vld [vmem:[%s887_s0 + $0x12] sm:$0xff]   ;;  %v758_v2 = vld [vmem:[%s887_s0 + $0xa] sm:$0xff]   ;;  %vm640_vm4 = vcmask 523520  }
   0x2   :  { %v273_v3 = vunpack.c.h.bf16 %v751_v0  ;;  %v289_v4 = vunpack.c.l.bf16 %v751_v0  ;;  %v321_v5 = vunpack.c.h.bf16 %v754_v1  ;;  %v762_v6 = vld [vmem:[%s887_s0 + $0x2] sm:$0xff]   ;;  %v353_v8 = vunpack.c.l.bf16 %v754_v1  ;;  %v735_v10 = vld [vmem:[%s887_s0 + $0x38] sm:$0xff]   ;;  %v739_v13 = vld [vmem:[%s887_s0 + $0x30] sm:$0xff]  }
   0x3   :  { %v509_v7 = vld [vmem:[%s887_s0] ss:$34 sps:$2 sm:$0xf]   ;;  %v385_v9 = vunpack.c.h.bf16 %v758_v2  ;;  %v417_v11 = vunpack.c.l.bf16 %v758_v2  ;;  %v449_v12 = vunpack.c.h.bf16 %v762_v6  ;;  %v481_v14 = vunpack.c.l.bf16 %v762_v6  ;;  %v743_v16 = vld [vmem:[%s887_s0 + $0x28] sm:$0xff]   ;;  %v747_v19 = vld [vmem:[%s887_s0 + $0x24] sm:$0xf]  }
   0x4   :  { %276 = vst [vmem:[#allocation1 + $0x78] ss:$8 sps:$4 sm:$0xff] %v273_v3   ;;  %292 = vst [vmem:[#allocation1 + $0x68] ss:$8 sps:$4 sm:$0xff] %v289_v4   ;;  %v510_v15 = vunpack.c.l.bf16 %v509_v7  ;;  %v17_v17 = vunpack.c.h.bf16 %v735_v10  ;;  %v49_v18 = vunpack.c.l.bf16 %v735_v10  ;;  %v81_v20 = vunpack.c.h.bf16 %v739_v13  ;;  %s813_s0 = smov 64  }
   0x5   :  { %324 = vst [vmem:[#allocation1 + $0x58] ss:$8 sps:$4 sm:$0xff] %v321_v5   ;;  %356 = vst [vmem:[#allocation1 + $0x48] ss:$8 sps:$4 sm:$0xff] %v353_v8   ;;  %v113_v21 = vunpack.c.l.bf16 %v739_v13  ;;  %v145_v22 = vunpack.c.h.bf16 %v743_v16  ;;  %v177_v23 = vunpack.c.l.bf16 %v743_v16  ;;  %v209_v24 = vunpack.c.l.bf16 %v747_v19 }
   0x6   :  { %388 = vst [vmem:[#allocation1 + $0x38] ss:$8 sps:$4 sm:$0xff] %v385_v9   ;;  %420 = vst [vmem:[#allocation1 + $0x28] ss:$8 sps:$4 sm:$0xff] %v417_v11  }
   0x7   :  { %452 = vst [vmem:[#allocation1 + $0x18] ss:$8 sps:$4 sm:$0xff] %v449_v12   ;;  %484 = vst [vmem:[#allocation1 + $0x8] ss:$8 sps:$4 sm:$0xff] %v481_v14  }
   0x8   :  { %512 = vst [vmem:[#allocation1] ss:$136 sps:$4 sm:$0xff] %v510_v15   ;;  %20 = vst [vmem:[#allocation1 + $0xf0] ss:$8 sps:$4 sm:$0xff] %v17_v17  }
   0x9   :  { %52 = vst [vmem:[#allocation1 + $0xe0] ss:$8 sps:$4 sm:$0xff] %v49_v18   ;;  %84 = vst [vmem:[#allocation1 + $0xd0] ss:$8 sps:$4 sm:$0xff] %v81_v20  }
   0xa   :  { %116 = vst [vmem:[#allocation1 + $0xc0] ss:$8 sps:$4 sm:$0xff] %v113_v21   ;;  %148 = vst [vmem:[#allocation1 + $0xb0] ss:$8 sps:$4 sm:$0xff] %v145_v22  }
   0xb   :  { %180 = vst [vmem:[#allocation1 + $0xa0] ss:$8 sps:$4 sm:$0xff] %v177_v23   ;;  %212 = vst [vmem:[#allocation1 + $0x90] ss:$8 sps:$4 sm:$0xff] %v209_v24  }
   0xc   :  { %v602_v25 = vld [vmem:[#allocation1 + $0x42] ss:$8 sm:$0xf0]   ;;  %v559_v26 = vld [vmem:[#allocation1 + $0x43] ss:$8 sm:$0xf0]  }
   0xd   :  { %v600_v27 = vld [vmem:[#allocation1 + $0x42] ss:$8 sm:$0xf]   ;;  %v557_v28 = vld [vmem:[#allocation1 + $0x43] ss:$8 sm:$0xf]  }
   0xe   :  { %v592_v29 = vld [vmem:[#allocation1 + $0x2] ss:$8 sm:$0xf0]   ;;  %v604_v30 = vsel %vm515_vm0, %v602_v25, %v600_v27  ;;  %v549_v31 = vld [vmem:[#allocation1 + $0x3] ss:$8 sm:$0xf0]   ;;  %v561_v32 = vsel %vm515_vm0, %v559_v26, %v557_v28 }
   0xf   :  { %v590_v33 = vld [vmem:[#allocation1 + $0x2] ss:$8 sm:$0xf]   ;;  %v547_v34 = vld [vmem:[#allocation1 + $0x3] ss:$8 sm:$0xf]  }
  0x10   :  { %v594_v35 = vsel %vm515_vm0, %v592_v29, %v590_v33  ;;  %v551_v36 = vsel %vm515_vm0, %v549_v31, %v547_v34  ;;  %v624_v37 = vld [vmem:[#allocation1 + $0xc2] ss:$8 sm:$0xf0]   ;;  %v581_v38 = vld [vmem:[#allocation1 + $0xc3] ss:$8 sm:$0xf0]  }
  0x11   :  { %v793_v39 = vpack.i.bf16 %v604_v30, %v594_v35  ;;  %v783_v40 = vpack.i.bf16 %v561_v32, %v551_v36  ;;  %v622_v41 = vld [vmem:[#allocation1 + $0xc2] ss:$8 sm:$0xf]   ;;  %v579_v42 = vld [vmem:[#allocation1 + $0xc3] ss:$8 sm:$0xf]  }
  0x12   :  { %v613_v43 = vld [vmem:[#allocation1 + $0x82] ss:$8 sm:$0xf0]   ;;  %v626_v44 = vsel %vm515_vm0, %v624_v37, %v622_v41  ;;  %v570_v45 = vld [vmem:[#allocation1 + $0x83] ss:$8 sm:$0xf0]   ;;  %v583_v46 = vsel %vm515_vm0, %v581_v38, %v579_v42 }
  0x13   :  { %794 = vrot.lane.b32.xlu1 %v793_v39, %s813_s0  ;;  %784 = vrot.lane.b32.xlu0 %v783_v40, %s814_s24  ;;  %v611_v47 = vld [vmem:[#allocation1 + $0x82] ss:$8 sm:$0xf]   ;;  %v568_v48 = vld [vmem:[#allocation1 + $0x83] ss:$8 sm:$0xf]  }
  0x14   :  { %v615_v49 = vsel %vm515_vm0, %v613_v43, %v611_v47  ;;  %v572_v50 = vsel %vm515_vm0, %v570_v45, %v568_v48  ;;  %v654_v51 = vld [vmem:[#allocation1 + $0x81] ss:$8 sm:$0xf]   ;;  %v513_v2 = vld [vmem:[#allocation1] ss:$8 sm:$0xf]  }
  0x15   :  { %v656_v52 = vld [vmem:[#allocation1 + $0x81] ss:$8 sm:$0xf0]   ;;  %v798_v53 = vpack.i.bf16 %v626_v44, %v615_v49  ;;  %v788_v54 = vpack.i.bf16 %v583_v46, %v572_v50  ;;  %v514_v3 = vld [vmem:[#allocation1] ss:$8 sm:$0xf0]  }
  0x16   :  { %v658_v55 = vsel %vm515_vm0, %v656_v52, %v654_v51  ;;  %v665_v56 = vld [vmem:[#allocation1 + $0xc1] ss:$8 sm:$0xf]   ;;  %v516_v5 = vsel %vm515_vm0, %v514_v3, %v513_v2  ;;  %v520_v6 = vld [vmem:[#allocation1 + $0x40] ss:$8 sm:$0xf]  }
  0x17   :  { %v667_v57 = vld [vmem:[#allocation1 + $0xc1] ss:$8 sm:$0xf0]   ;;  %799 = vrot.lane.b32.xlu1 %v798_v53, %s813_s0  ;;  %789 = vrot.lane.b32.xlu0 %v788_v54, %s814_s24  ;;  %v522_v7 = vld [vmem:[#allocation1 + $0x40] ss:$8 sm:$0xf0]  }
  0x18   :  { %v669_v58 = vsel %vm515_vm0, %v667_v57, %v665_v56  ;;  %v633_v59 = vld [vmem:[#allocation1 + $0x1] ss:$8 sm:$0xf]   ;;  %518 = vst.msk [vmem:[#allocation0] sm:$0xff] %vm517_vm1, %v516_v5   ;;  %v524_v8 = vsel %vm515_vm0, %v522_v7, %v520_v6 }
  0x19   :  { %v635_v60 = vld [vmem:[#allocation1 + $0x1] ss:$8 sm:$0xf0]   ;;  %v808_v61 = vpack.i.bf16 %v669_v58, %v658_v55  ;;  %v529_v9 = vld [vmem:[#allocation1 + $0x80] ss:$8 sm:$0xf]  }
  0x1a   :  { %v637_v62 = vsel %vm515_vm0, %v635_v60, %v633_v59  ;;  %v643_v63 = vld [vmem:[#allocation1 + $0x41] ss:$8 sm:$0xf]   ;;  %v531_v10 = vld [vmem:[#allocation1 + $0x80] ss:$8 sm:$0xf0]  }
  0x1b   :  { %v645_v0 = vld [vmem:[#allocation1 + $0x41] ss:$8 sm:$0xf0]   ;;  %809 = vrot.lane.b32.xlu1 %v808_v61, %s815_s25  ;;  %527 = vst.msk [vmem:[#allocation0 + $0x8] sm:$0xff] %vm517_vm1, %v524_v8   ;;  %v533_v11 = vsel %vm515_vm0, %v531_v10, %v529_v9 }
  0x1c   :  { %v647_v1 = vsel %vm515_vm0, %v645_v0, %v643_v63  ;;  %v538_v12 = vld [vmem:[#allocation1 + $0xc0] ss:$8 sm:$0xf]   ;;  %536 = vst.msk [vmem:[#allocation0 + $0x10] sm:$0xff] %vm517_vm1, %v533_v11  }
  0x1d   :  { %v803_v4 = vpack.i.bf16 %v647_v1, %v637_v62  ;;  %v540_v13 = vld [vmem:[#allocation1 + $0xc0] ss:$8 sm:$0xf0]  }
  0x1e   :  { %v542_v14 = vsel %vm515_vm0, %v540_v13, %v538_v12 }
  0x1f   :  { %804 = vrot.lane.b32.xlu0 %v803_v4, %s815_s25  ;;  %545 = vst.msk [vmem:[#allocation0 + $0x18] sm:$0xff] %vm517_vm1, %v542_v14  }
  0x85   :  { %v795_v15 = vpop.permute.xlu1 %794  ;;  %v785_v16 = vpop.permute.xlu0 %784 }
  0x86   :  { %v797_v17 = vunpack.i.h.bf16 %v795_v15  ;;  %v796_v18 = vunpack.i.l.bf16 %v795_v15  ;;  %v787_v19 = vunpack.i.h.bf16 %v785_v16  ;;  %v786_v20 = vunpack.i.l.bf16 %v785_v16 }
  0x88   :  { %555 = vst.msk [vmem:[#allocation0] sm:$0xff] %vm554_vm3, %v786_v20   ;;  %566 = vst.msk [vmem:[#allocation0 + $0x8] sm:$0xff] %vm554_vm3, %v787_v19  }
  0x89   :  { %598 = vst.msk [vmem:[#allocation0] sm:$0xff] %vm597_vm2, %v796_v18   ;;  %609 = vst.msk [vmem:[#allocation0 + $0x8] sm:$0xff] %vm597_vm2, %v797_v17   ;;  %v800_v21 = vpop.permute.xlu1 %799  ;;  %v790_v22 = vpop.permute.xlu0 %789 }
  0x8a   :  { %v802_v23 = vunpack.i.h.bf16 %v800_v21  ;;  %v801_v24 = vunpack.i.l.bf16 %v800_v21  ;;  %v792_v25 = vunpack.i.h.bf16 %v790_v22  ;;  %v791_v26 = vunpack.i.l.bf16 %v790_v22 }
  0x8c   :  { %577 = vst.msk [vmem:[#allocation0 + $0x10] sm:$0xff] %vm554_vm3, %v791_v26   ;;  %588 = vst.msk [vmem:[#allocation0 + $0x18] sm:$0xff] %vm554_vm3, %v792_v25  }
  0x8d   :  { %620 = vst.msk [vmem:[#allocation0 + $0x10] sm:$0xff] %vm597_vm2, %v801_v24   ;;  %631 = vst.msk [vmem:[#allocation0 + $0x18] sm:$0xff] %vm597_vm2, %v802_v23   ;;  %v810_v27 = vpop.permute.xlu1 %809 }
  0x8e   :  { %v812_v29 = vunpack.i.h.bf16 %v810_v27  ;;  %v811_v30 = vunpack.i.l.bf16 %v810_v27 }
  0x90   :  { %663 = vst.msk [vmem:[#allocation0 + $0x10] sm:$0xff] %vm640_vm4, %v811_v30   ;;  %674 = vst.msk [vmem:[#allocation0 + $0x18] sm:$0xff] %vm640_vm4, %v812_v29  }
  0x91   :  { %v805_v28 = vpop.permute.xlu0 %804 }
  0x92   :  { %v807_v31 = vunpack.i.h.bf16 %v805_v28  ;;  %v806_v32 = vunpack.i.l.bf16 %v805_v28 }
  0x94   :  { %652 = vst.msk [vmem:[#allocation0 + $0x8] sm:$0xff] %vm640_vm4, %v807_v31   ;;  %641 = vst.msk [vmem:[#allocation0] sm:$0xff] %vm640_vm4, %v806_v32  }
  0x97   :  { %v690_v33 = vld [vmem:[#allocation0 + $0x10] sm:$0xff]  ;;  %v697_v34 = vld [vmem:[#allocation0 + $0x18] sm:$0xff] }
  0x98   :  { %v777_v36 = vpack.c.bf16 %v697_v34, %v690_v33 }
  0x9a   :  { %779 = vst [vmem:[%s888_s1 + $0x8] sm:$0xff] %v777_v36  }
  0x9b   :  { %v684_v35 = vld [vmem:[#allocation0 + $0x8] sm:$0xff]  ;;  %v679_v37 = vld [vmem:[#allocation0] sm:$0xff] }
  0x9c   :  { %v772_v38 = vpack.c.bf16 %v684_v35, %v679_v37 }
  0x9e   :  { %773 = vst [vmem:[%s888_s1] sm:$0xff] %v772_v38  }

// kernel: relation_model_forward.1
= control target key start
LH: loop header
LB: loop body
LE: loop exit
PB: predicated region body
PF: predicated region fallthrough
CT: control target
= control target key end

     0   :  { %vm314_vm0 = vcmask 261120   ;;  %v1812_v10 = vmov 0   ;;  %vm1814_vm1 = vmmov 0   ;;  %s2237_s2 = inlined_call_operand.vmem [shape: bf16[288,32], index: 2, kind: input, shape index: {}]   ;;  %s2238_s0 = inlined_call_operand.vmem [shape: bf16[128,288], index: 0, kind: input, shape index: {}]   ;;  %s2239_s3 = inlined_call_operand.vmem [shape: bf16[160,32], index: 3, kind: input, shape index: {}]   ;;  %s2240_s1 = inlined_call_operand.vmem [shape: bf16[128,160], index: 1, kind: input, shape index: {}]   ;;  %s2241_s4 = inlined_call_operand.vmem [shape: f32[1,128], index: 4, kind: output, shape index: {}]  }
   0x1   :  { %v1724_v0 = vld [vmem:[%s2237_s2 + $0x40] sm:$0xff]   ;;  %v1727_v3 = vld [vmem:[%s2237_s2 + $0x48] sm:$0xff]   ;;  %v1731_v7 = vld [vmem:[%s2237_s2 + $0x50] sm:$0xff]  }
   0x2   :  { %v1725_v1 = vld [vmem:[%s2237_s2 + $0x80] sm:$0xff]   ;;  %1373 = vmatprep.subr.bf16.mxu0 %v1724_v0  ;;  %v1728_v4 = vld [vmem:[%s2237_s2 + $0x88] sm:$0xff]   ;;  %v1733_v9 = vld [vmem:[%s2237_s2 + $0x10] sm:$0xff]  }
   0x3   :  { %v1726_v2 = vld [vmem:[%s2237_s2] sm:$0xff]   ;;  %1498 = vmatprep.subr.bf16.mxu1 %v1725_v1  ;;  %v1729_v5 = vld [vmem:[%s2237_s2 + $0x8] sm:$0xff]   ;;  %v1735_v12 = vld [vmem:[%s2237_s2 + $0x58] sm:$0xff]  }
   0x4   :  { %1374 = vmatpush3.bf16.msra.mxu0 %v1726_v2  ;;  %1499 = vmatpush3.bf16.msra.mxu1 %v1725_v1  ;;  %v1730_v6 = vld [vmem:[%s2238_s0 + $0x8] ss:$12 sps:$4 sm:$0xff]   ;;  %v1732_v8 = vld [vmem:[%s2238_s0 + $0x20] ss:$12 sps:$4 sm:$0xff]   ;;  %v1736_v13 = vld [vmem:[%s2237_s2 + $0x18] sm:$0xff]  }
   0x5   :  { %1375 = vmatprep.subr.bf16.mxu0 %v1727_v3  ;;  %1500 = vmatprep.subr.bf16.mxu1 %v1728_v4  ;;  %v1734_v11 = vld [vmem:[%s2239_s3] sm:$0xff]   ;;  %v1737_v14 = vld [vmem:[%s2239_s3 + $0x8] sm:$0xff]   ;;  %v1740_v17 = vld [vmem:[%s2239_s3 + $0x10] sm:$0xff]  }
   0x6   :  { %1502 = vmatprep.mubr.msk.bf16.mxu1 %vm314_vm0, %v1730_v6  ;;  %v1738_v15 = vld [vmem:[%s2237_s2 + $0x60] sm:$0xff]   ;;  %v1741_v18 = vld [vmem:[%s2237_s2 + $0x68] sm:$0xff]   ;;  %v1744_v21 = vld [vmem:[%s2238_s0 + $0x50] ss:$12 sps:$4 sm:$0xff]   ;;  %v1815_v6 = vmov 0.0  }
   0x7   :  { %v1739_v16 = vld [vmem:[%s2237_s2 + $0x20] sm:$0xff]   ;;  %v1743_v20 = vld [vmem:[%s2237_s2 + $0x28] sm:$0xff]   ;;  %v1745_v22 = vld [vmem:[%s2239_s3 + $0x18] sm:$0xff]  }
   0x8   :  { %1376 = vmatpush3.bf16.msra.mxu0 %v1729_v5  ;;  %1501 = vmatpush3.bf16.msra.mxu1 %v1728_v4  ;;  %v1742_v19 = vld [vmem:[%s2238_s0 + $0x38] ss:$12 sps:$4 sm:$0xff]   ;;  %v1746_v23 = vld [vmem:[%s2237_s2 + $0x70] sm:$0xff]   ;;  %v1752_v29 = vld [vmem:[%s2238_s0 + $0x80] ss:$12 sps:$4 sm:$0xff]   ;;  %v1813_v5 = vmov 0.0|0.0  }
   0x9   :  { %1377 = vmatprep.subr.bf16.mxu0 %v1731_v7  ;;  %725 = vmatprep.subr.bf16.mxu1 %v1812_v10  ;;  %v1747_v24 = vld [vmem:[%s2237_s2 + $0x30] sm:$0xff]   ;;  %v1748_v25 = vld [vmem:[%s2239_s3 + $0x20] sm:$0xff]   ;;  %v1749_v26 = vld [vmem:[%s2237_s2 + $0x78] sm:$0xff]  }
   0xa   :  { %v1750_v27 = vld [vmem:[%s2238_s0 + $0x68] ss:$12 sps:$4 sm:$0xff]   ;;  %v1751_v28 = vld [vmem:[%s2237_s2 + $0x38] sm:$0xff]   ;;  %v1754_v31 = vld [vmem:[%s2238_s0] ss:$12 sps:$4 sm:$0xff]  }
   0xb   :  { %1503 = vmatmul.mubr.msk.bf16.vlgmr.msra.gmra.mrb[0].mxu1 %vm314_vm0, %v1732_v8  ;;  %v1753_v30 = vld [vmem:[%s2239_s3 + $0x28] sm:$0xff]   ;;  %v1756_v32 = vld [vmem:[%s2238_s0 + $0x4] ss:$12 sps:$4 sm:$0xff]   ;;  %v1760_v36 = vld [vmem:[%s2239_s3 + $0x38] sm:$0xff]  }
   0xc   :  { %1378 = vmatpush3.bf16.msra.mxu0 %v1733_v9  ;;  %726 = vmatpush1.bf16.msra.mxu1 %v1734_v11  ;;  %v1757_v33 = vld [vmem:[%s2239_s3 + $0x30] sm:$0xff]   ;;  %v1758_v34 = vld [vmem:[%s2238_s0 + $0x98] ss:$12 sps:$4 sm:$0xff]   ;;  %v1761_v37 = vld [vmem:[%s2238_s0 + $0x1c] ss:$12 sps:$4 sm:$0xff]  }
   0xd   :  { %1379 = vmatprep.subr.bf16.mxu0 %v1735_v12  ;;  %727 = vmatprep.subr.bf16.mxu1 %v1812_v10  ;;  %v1759_v35 = vld [vmem:[%s2238_s0 + $0xb0] ss:$12 sps:$4 sm:$0xff]   ;;  %v1763_v38 = vld [vmem:[%s2238_s0 + $0x18] ss:$12 sps:$4 sm:$0xff]   ;;  %v1766_v40 = vld [vmem:[%s2238_s0 + $0x34] ss:$12 sps:$4 sm:$0xff]  }
   0xe   :  { %1506 = vmatprep.mubr.msk.bf16.mxu1 %vm314_vm0, %v1742_v19  ;;  %371 = vmatprep.mubr.bf16.mxu0 %v1756_v32  ;;  %v1764_v39 = vld [vmem:[%s2239_s3 + $0x40] sm:$0xff]   ;;  %v1765_v42 = vld [vmem:[%s2239_s3 + $0x48] sm:$0xff]   ;;  %v1771_v44 = vld [vmem:[%s2238_s0 + $0x30] ss:$12 sps:$4 sm:$0xff]  }
   0xf   :  { %v1770_v41 = vld [vmem:[%s2240_s1 + $0x4] ss:$8 sps:$4 sm:$0xff]   ;;  %v1768_v43 = vld [vmem:[%s2240_s1] ss:$8 sps:$4 sm:$0xff]   ;;  %v1774_v46 = vld [vmem:[%s2240_s1 + $0x14] ss:$8 sps:$4 sm:$0xff]  }
  0x10   :  { %1380 = vmatpush3.bf16.msra.mxu0 %v1736_v13  ;;  %728 = vmatpush1.bf16.msra.mxu1 %v1737_v14  ;;  %v1772_v45 = vld [vmem:[%s2238_s0 + $0x4c] ss:$12 sps:$4 sm:$0xff]   ;;  %v1776_v47 = vld [vmem:[%s2238_s0 + $0x48] ss:$12 sps:$4 sm:$0xff]   ;;  %v1778_v49 = vld [vmem:[%s2238_s0 + $0x64] ss:$12 sps:$4 sm:$0xff]  }
  0x11   :  { %1381 = vmatprep.subr.bf16.mxu0 %v1738_v15  ;;  %729 = vmatprep.subr.bf16.mxu1 %v1812_v10  ;;  %v1777_v48 = vld [vmem:[%s2240_s1 + $0x10] ss:$8 sps:$4 sm:$0xff]   ;;  %v1780_v50 = vld [vmem:[%s2240_s1 + $0x24] ss:$8 sps:$4 sm:$0xff]   ;;  %v1783_v52 = vld [vmem:[%s2240_s1 + $0x20] ss:$8 sps:$4 sm:$0xff]  }
  0x12   :  { %v1782_v51 = vld [vmem:[%s2238_s0 + $0x60] ss:$12 sps:$4 sm:$0xff]   ;;  %v1784_v53 = vld [vmem:[%s2238_s0 + $0x7c] ss:$12 sps:$4 sm:$0xff]   ;;  %v1788_v55 = vld [vmem:[%s2238_s0 + $0x78] ss:$12 sps:$4 sm:$0xff]  }
  0x13   :  { %1507 = vmatmul.mubr.msk.bf16.gmra.mrb[4].mxu1 %vm314_vm0, %v1744_v21  ;;  %v1786_v54 = vld [vmem:[%s2240_s1 + $0x34] ss:$8 sps:$4 sm:$0xff]   ;;  %v1789_v56 = vld [vmem:[%s2240_s1 + $0x30] ss:$8 sps:$4 sm:$0xff]   ;;  %v1792_v58 = vld [vmem:[%s2240_s1 + $0x44] ss:$8 sps:$4 sm:$0xff]  }
  0x14   :  { %1382 = vmatpush3.bf16.msra.mxu0 %v1739_v16  ;;  %730 = vmatpush1.bf16.msra.mxu1 %v1740_v17  ;;  %v1790_v57 = vld [vmem:[%s2238_s0 + $0x94] ss:$12 sps:$4 sm:$0xff]   ;;  %v1794_v59 = vld [vmem:[%s2238_s0 + $0x90] ss:$12 sps:$4 sm:$0xff]   ;;  %v1796_v61 = vld [vmem:[%s2238_s0 + $0xac] ss:$12 sps:$4 sm:$0xff]  }
  0x15   :  { %1383 = vmatprep.subr.bf16.mxu0 %v1741_v18  ;;  %731 = vmatprep.subr.bf16.mxu1 %v1812_v10  ;;  %v1795_v60 = vld [vmem:[%s2240_s1 + $0x40] ss:$8 sps:$4 sm:$0xff]   ;;  %v1798_v62 = vld [vmem:[%s2240_s1 + $0x54] ss:$8 sps:$4 sm:$0xff]   ;;  %v1801_v0 = vld [vmem:[%s2240_s1 + $0x50] ss:$8 sps:$4 sm:$0xff]  }
  0x16   :  { %1510 = vmatprep.mubr.msk.bf16.mxu1 %vm314_vm0, %v1750_v27  ;;  %v1800_v63 = vld [vmem:[%s2238_s0 + $0xa8] ss:$12 sps:$4 sm:$0xff]   ;;  %v1802_v1 = vld [vmem:[%s2240_s1 + $0x64] ss:$8 sps:$4 sm:$0xff]   ;;  %v1807_v4 = vld [vmem:[%s2240_s1 + $0x70] ss:$8 sps:$4 sm:$0xff]  }
  0x17   :  { %v1804_v2 = vld [vmem:[%s2240_s1 + $0x60] ss:$8 sps:$4 sm:$0xff]   ;;  %v1805_v3 = vld [vmem:[%s2240_s1 + $0x74] ss:$8 sps:$4 sm:$0xff]   ;;  %vm2100_vm2 = vmpackc.low %vm314_vm0, %vm314_vm0 }
  0x18   :  { %1384 = vmatpush3.bf16.msra.mxu0 %v1743_v20  ;;  %732 = vmatpush1.bf16.msra.mxu1 %v1745_v22 }
  0x19   :  { %1385 = vmatprep.subr.bf16.mxu0 %v1746_v23  ;;  %733 = vmatprep.subr.bf16.mxu1 %v1812_v10 }
  0x1b   :  { %1511 = vmatmul.mubr.msk.bf16.gmra.mrb[8].mxu1 %vm314_vm0, %v1752_v29 }
  0x1c   :  { %1386 = vmatpush3.bf16.msra.mxu0 %v1747_v24  ;;  %734 = vmatpush1.bf16.msra.mxu1 %v1748_v25 }
  0x1d   :  { %1387 = vmatprep.subr.bf16.mxu0 %v1749_v26  ;;  %735 = vmatprep.subr.bf16.mxu1 %v1812_v10 }
  0x1e   :  { %1514 = vmatprep.mubr.msk.bf16.mxu1 %vm314_vm0, %v1758_v34 }
  0x20   :  { %1388 = vmatpush3.bf16.msra.mxu0 %v1751_v28  ;;  %736 = vmatpush1.bf16.msra.mxu1 %v1753_v30 }
  0x21   :  { %737 = vmatprep.subr.bf16.mxu1 %v1812_v10  ;;  %1623 = vmatprep.subr.bf16.mxu0 %v1813_v5 }
  0x23   :  { %372 = vmatmul.mubr.bf16.vlgmr.msra.gmra.mrb[0].mxu0 %v1754_v31  ;;  %1515 = vmatmul.mubr.msk.bf16.gmra.mrb[12].mxu1 %vm314_vm0, %v1759_v35 }
  0x24   :  { %738 = vmatpush1.bf16.msra.mxu1 %v1757_v33  ;;  %379 = vmatprep.mubr.bf16.mxu0 %v1761_v37 }
  0x25   :  { %739 = vmatprep.subr.bf16.mxu1 %v1812_v10  ;;  %1314 = vmatprep.mubr.msk.bf16.mxu1 %vm314_vm0, %v1770_v41 }
  0x28   :  { %740 = vmatpush1.bf16.msra.mxu1 %v1760_v36 }
  0x29   :  { %741 = vmatprep.subr.bf16.mxu1 %v1812_v10 }
  0x2b   :  { %380 = vmatmul.mubr.bf16.gmra.mrb[4].mxu0 %v1763_v38 }
  0x2c   :  { %742 = vmatpush1.bf16.msra.mxu1 %v1764_v39  ;;  %387 = vmatprep.mubr.bf16.mxu0 %v1766_v40 }
  0x2d   :  { %743 = vmatprep.subr.bf16.mxu1 %v1812_v10 }
  0x30   :  { %744 = vmatpush1.bf16.msra.mxu1 %v1765_v42 }
  0x31   :  { %1655 = vmatprep.subr.bf16.mxu1 %v1813_v5 }
  0x33   :  { %388 = vmatmul.mubr.bf16.gmra.mrb[8].mxu0 %v1771_v44  ;;  %758 = vmatmul.mubr.bf16.vlgmr.msra.gmra.mrb[16].mxu1 %v1768_v43 }
  0x34   :  { %395 = vmatprep.mubr.bf16.mxu0 %v1772_v45  ;;  %1315 = vmatprep.mubr.msk.bf16.mxu1 %vm314_vm0, %v1774_v46 }
  0x3b   :  { %396 = vmatmul.mubr.bf16.gmra.mrb[12].mxu0 %v1776_v47  ;;  %766 = vmatmul.mubr.bf16.gmra.mrb[20].mxu1 %v1777_v48 }
  0x3c   :  { %403 = vmatprep.mubr.bf16.mxu0 %v1778_v49  ;;  %1316 = vmatprep.mubr.msk.bf16.mxu1 %vm314_vm0, %v1780_v50 }
  0x43   :  { %404 = vmatmul.mubr.bf16.gmra.mrb[16].mxu0 %v1782_v51  ;;  %774 = vmatmul.mubr.bf16.gmra.mrb[24].mxu1 %v1783_v52 }
  0x44   :  { %411 = vmatprep.mubr.bf16.mxu0 %v1784_v53  ;;  %1317 = vmatprep.mubr.msk.bf16.mxu1 %vm314_vm0, %v1786_v54 }
  0x4b   :  { %412 = vmatmul.mubr.bf16.gmra.mrb[20].mxu0 %v1788_v55  ;;  %782 = vmatmul.mubr.bf16.gmra.mrb[28].mxu1 %v1789_v56 }
  0x4c   :  { %419 = vmatprep.mubr.bf16.mxu0 %v1790_v57  ;;  %1318 = vmatprep.mubr.msk.bf16.mxu1 %vm314_vm0, %v1792_v58 }
  0x53   :  { %420 = vmatmul.mubr.bf16.gmra.mrb[24].mxu0 %v1794_v59  ;;  %790 = vmatmul.mubr.bf16.gmra.mrb[32].mxu1 %v1795_v60 }
  0x54   :  { %427 = vmatprep.mubr.bf16.mxu0 %v1796_v61  ;;  %1319 = vmatprep.mubr.msk.bf16.mxu1 %vm314_vm0, %v1798_v62 }
  0x5b   :  { %428 = vmatmul.mubr.bf16.gmra.mrb[28].mxu0 %v1800_v63  ;;  %798 = vmatmul.mubr.bf16.gmra.mrb[36].mxu1 %v1801_v0 }
  0x5c   :  { %1320 = vmatprep.mubr.msk.bf16.mxu1 %vm314_vm0, %v1802_v1  ;;  %1550 = vmatprep.mubr.msk.f32.mxu0 %vm1814_vm1, %v1815_v6 }
  0x63   :  { %806 = vmatmul.mubr.bf16.gmra.mrb[40].mxu1 %v1804_v2 }
  0x64   :  { %1321 = vmatprep.mubr.msk.bf16.mxu1 %vm314_vm0, %v1805_v3 }
  0x6b   :  { %814 = vmatmul.mubr.bf16.gmra.mrb[44].mxu1 %v1807_v4 }
  0x6c   :  { %1585 = vmatprep.mubr.msk.f32.mxu1 %vm1814_vm1, %v1815_v6 }
  0xde   :  { %v1504_v7 = vpop.f32.mrb[0].mxu1 }
  0xdf   :  { %v470_v8 = vpop.f32.mrb[1].mxu1 }
  0xe0   :  { %v1505_v9 = vpop.f32.mrb[2].mxu1 }
  0xe1   :  { %v473_v10 = vpop.f32.mrb[3].mxu1 }
  0xe6   :  { %v2078_v11 = vpop.f32.mrb[4].mxu1 }
  0xe7   :  { %v486_v12 = vpop.f32.mrb[5].mxu1 }
  0xe8   :  { %v2080_v13 = vpop.f32.mrb[6].mxu1 }
  0xe9   :  { %v489_v14 = vpop.f32.mrb[7].mxu1 }
  0xee   :  { %v2082_v15 = vpop.f32.mrb[8].mxu1 }
  0xef   :  { %v2084_v16 = vpop.f32.mrb[9].mxu1 }
  0xf0   :  { %v2086_v17 = vpop.f32.mrb[10].mxu1 }
  0xf1   :  { %v2088_v18 = vpop.f32.mrb[11].mxu1 }
  0xf6   :  { %v1389_v19 = vpop.f32.mrb[0].mxu0  ;;  %v2090_v24 = vpop.f32.mrb[12].mxu1 }
  0xf7   :  { %v1390_v20 = vpop.f32.mrb[1].mxu0  ;;  %v2092_v27 = vpop.f32.mrb[13].mxu1 }
  0xf8   :  { %v1391_v21 = vadd.f32 %v1390_v20, %v1389_v19  ;;  %v1392_v22 = vpop.f32.mrb[2].mxu0  ;;  %v2094_v28 = vpop.f32.mrb[14].mxu1 }
  0xf9   :  { %v1393_v23 = vpop.f32.mrb[3].mxu0  ;;  %v2096_v30 = vpop.f32.mrb[15].mxu1 }
  0xfa   :  { %v471_v25 = vadd.f32 %v1391_v21, %v470_v8  ;;  %v1394_v26 = vadd.f32 %v1393_v23, %v1392_v22 }
  0xfc   :  { %v474_v29 = vadd.f32 %v1394_v26, %v473_v10  ;;  %v959_v31 = vmul.f32 %v471_v25, %v471_v25 }
  0xfe   :  { %v960_v32 = vmul.f32 %v474_v29, %v474_v29  ;;  %v1395_v33 = vpop.f32.mrb[4].mxu0 }
  0xff   :  { %v1396_v34 = vpop.f32.mrb[5].mxu0 }
 0x100   :  { %v1656_v36 = vpack.c.bf16 %v960_v32, %v959_v31  ;;  %v1397_v37 = vadd.f32 %v1396_v34, %v1395_v33  ;;  %v1398_v38 = vpop.f32.mrb[6].mxu0 }
 0x101   :  { %v1399_v39 = vpop.f32.mrb[7].mxu0 }
 0x102   :  { %v479_v40 = vadd.f32 %v1504_v7, %v1397_v37  ;;  %v1400_v41 = vadd.f32 %v1399_v39, %v1398_v38  ;;  %1658 = vmatpush3.bf16.xpose.msk.msra.mxu1 %vm2100_vm2, %v1656_v36 }
 0x103   :  { %1659 = vmatprep.subr.bf16.mxu1 %v1813_v5 }
 0x104   :  { %v482_v42 = vadd.f32 %v1505_v9, %v1400_v41  ;;  %v961_v43 = vmul.f32 %v479_v40, %v479_v40 }
 0x106   :  { %v962_v44 = vmul.f32 %v482_v42, %v482_v42  ;;  %v1401_v45 = vpop.f32.mrb[8].mxu0  ;;  %v759_v46 = vpop.f32.mrb[16].mxu1 }
 0x107   :  { %v822_v47 = vmul.f32 %v759_v46, %v471_v25  ;;  %v1402_v48 = vpop.f32.mrb[9].mxu0  ;;  %v761_v49 = vpop.f32.mrb[17].mxu1  ;;  %v2107_v54 = vmul.f32 %v759_v46, %v759_v46 }
 0x108   :  { %v1660_v50 = vpack.c.bf16 %v962_v44, %v961_v43  ;;  %v1403_v51 = vadd.f32 %v1402_v48, %v1401_v45  ;;  %v1404_v52 = vpop.f32.mrb[10].mxu0  ;;  %v762_v53 = vpop.f32.mrb[18].mxu1 }
 0x109   :  { %v823_v55 = vmul.f32 %v762_v53, %v474_v29  ;;  %v2109_v56 = vmul.f32 %v762_v53, %v762_v53  ;;  %v1405_v57 = vpop.f32.mrb[11].mxu0  ;;  %v764_v58 = vpop.f32.mrb[19].mxu1 }
 0x10a   :  { %v487_v59 = vadd.f32 %v1403_v51, %v486_v12  ;;  %v1406_v60 = vadd.f32 %v1405_v57, %v1404_v52  ;;  %1662 = vmatpush3.bf16.xpose.msk.msra.mxu1 %vm2100_vm2, %v1660_v50 }
 0x10b   :  { %v1624_v61 = vpack.c.bf16 %v823_v55, %v822_v47  ;;  %v1688_v62 = vpack.c.bf16 %v2109_v56, %v2107_v54  ;;  %1663 = vmatprep.subr.bf16.mxu1 %v1813_v5 }
 0x10c   :  { %v490_v63 = vadd.f32 %v1406_v60, %v489_v14  ;;  %v963_v0 = vmul.f32 %v487_v59, %v487_v59 }
 0x10d   :  { %1626 = vmatpush3.bf16.xpose.msk.msra.mxu0 %vm2100_vm2, %v1624_v61 }
 0x10e   :  { %v964_v1 = vmul.f32 %v490_v63, %v490_v63  ;;  %v1407_v2 = vpop.f32.mrb[12].mxu0  ;;  %v767_v3 = vpop.f32.mrb[20].mxu1  ;;  %1627 = vmatprep.subr.bf16.mxu0 %v1813_v5 }
 0x10f   :  { %v824_v4 = vmul.f32 %v767_v3, %v479_v40  ;;  %v1408_v7 = vpop.f32.mrb[13].mxu0  ;;  %v769_v8 = vpop.f32.mrb[21].mxu1  ;;  %v2119_v20 = vmul.f32 %v767_v3, %v767_v3 }
 0x110   :  { %v1664_v9 = vpack.c.bf16 %v964_v1, %v963_v0  ;;  %v1409_v10 = vadd.f32 %v1408_v7, %v1407_v2  ;;  %v1410_v12 = vpop.f32.mrb[14].mxu0  ;;  %v770_v19 = vpop.f32.mrb[22].mxu1 }
 0x111   :  { %v825_v21 = vmul.f32 %v770_v19, %v482_v42  ;;  %v2121_v14 = vmul.f32 %v770_v19, %v770_v19  ;;  %v1411_v22 = vpop.f32.mrb[15].mxu0  ;;  %v772_v23 = vpop.f32.mrb[23].mxu1 }
 0x112   :  { %v495_v25 = vadd.f32 %v2078_v11, %v1409_v10  ;;  %v1412_v26 = vadd.f32 %v1411_v22, %v1410_v12  ;;  %1666 = vmatpush3.bf16.xpose.msk.msra.mxu1 %vm2100_vm2, %v1664_v9 }
 0x113   :  { %v1628_v29 = vpack.c.bf16 %v825_v21, %v824_v4  ;;  %v1692_v31 = vpack.c.bf16 %v2121_v14, %v2119_v20  ;;  %1667 = vmatprep.subr.bf16.mxu1 %v1813_v5 }
 0x114   :  { %v498_v32 = vadd.f32 %v2080_v13, %v1412_v26  ;;  %v965_v33 = vmul.f32 %v495_v25, %v495_v25 }
 0x115   :  { %1630 = vmatpush3.bf16.xpose.msk.msra.mxu0 %vm2100_vm2, %v1628_v29 }
 0x116   :  { %v966_v34 = vmul.f32 %v498_v32, %v498_v32  ;;  %v1413_v36 = vpop.f32.mrb[16].mxu0  ;;  %v775_v37 = vpop.f32.mrb[24].mxu1  ;;  %1631 = vmatprep.subr.bf16.mxu0 %v1813_v5 }
 0x117   :  { %v826_v11 = vmul.f32 %v775_v37, %v487_v59  ;;  %v1414_v38 = vpop.f32.mrb[17].mxu0  ;;  %v777_v39 = vpop.f32.mrb[25].mxu1  ;;  %v2133_v44 = vmul.f32 %v775_v37, %v775_v37 }
 0x118   :  { %v1668_v40 = vpack.c.bf16 %v966_v34, %v965_v33  ;;  %v1415_v41 = vadd.f32 %v1414_v38, %v1413_v36  ;;  %v1416_v42 = vpop.f32.mrb[18].mxu0  ;;  %v778_v43 = vpop.f32.mrb[26].mxu1 }
 0x119   :  { %v827_v45 = vmul.f32 %v778_v43, %v490_v63  ;;  %v2135_v13 = vmul.f32 %v778_v43, %v778_v43  ;;  %v1417_v46 = vpop.f32.mrb[19].mxu0  ;;  %v780_v47 = vpop.f32.mrb[27].mxu1 }
 0x11a   :  { %v503_v48 = vadd.f32 %v1415_v41, %v2084_v16  ;;  %v1418_v49 = vadd.f32 %v1417_v46, %v1416_v42  ;;  %1670 = vmatpush3.bf16.xpose.msk.msra.mxu1 %vm2100_vm2, %v1668_v40 }
 0x11b   :  { %v1632_v50 = vpack.c.bf16 %v827_v45, %v826_v11  ;;  %v1696_v51 = vpack.c.bf16 %v2135_v13, %v2133_v44  ;;  %1671 = vmatprep.subr.bf16.mxu1 %v1813_v5 }
 0x11c   :  { %v506_v52 = vadd.f32 %v1418_v49, %v2088_v18  ;;  %v967_v53 = vmul.f32 %v503_v48, %v503_v48 }
 0x11d   :  { %1634 = vmatpush3.bf16.xpose.msk.msra.mxu0 %vm2100_vm2, %v1632_v50 }
 0x11e   :  { %v968_v55 = vmul.f32 %v506_v52, %v506_v52  ;;  %v1419_v57 = vpop.f32.mrb[20].mxu0  ;;  %v783_v58 = vpop.f32.mrb[28].mxu1  ;;  %1635 = vmatprep.subr.bf16.mxu0 %v1813_v5 }
 0x11f   :  { %v828_v16 = vmul.f32 %v783_v58, %v495_v25  ;;  %v1420_v59 = vpop.f32.mrb[21].mxu0  ;;  %v785_v60 = vpop.f32.mrb[29].mxu1  ;;  %v2147_v2 = vmul.f32 %v783_v58, %v783_v58 }
 0x120   :  { %v1672_v61 = vpack.c.bf16 %v968_v55, %v967_v53  ;;  %v1421_v63 = vadd.f32 %v1420_v59, %v1419_v57  ;;  %v1422_v0 = vpop.f32.mrb[22].mxu0  ;;  %v786_v1 = vpop.f32.mrb[30].mxu1 }
 0x121   :  { %v829_v3 = vmul.f32 %v786_v1, %v498_v32  ;;  %v2149_v18 = vmul.f32 %v786_v1, %v786_v1  ;;  %v1423_v4 = vpop.f32.mrb[23].mxu0  ;;  %v788_v7 = vpop.f32.mrb[31].mxu1 }
 0x122   :  { %v511_v8 = vadd.f32 %v2082_v15, %v1421_v63  ;;  %v1424_v9 = vadd.f32 %v1423_v4, %v1422_v0  ;;  %1674 = vmatpush3.bf16.xpose.msk.msra.mxu1 %vm2100_vm2, %v1672_v61 }
 0x123   :  { %v1636_v10 = vpack.c.bf16 %v829_v3, %v828_v16  ;;  %v1700_v12 = vpack.c.bf16 %v2149_v18, %v2147_v2  ;;  %1675 = vmatprep.subr.bf16.mxu1 %v1813_v5 }
 0x124   :  { %v514_v19 = vadd.f32 %v2086_v17, %v1424_v9  ;;  %v969_v21 = vmul.f32 %v511_v8, %v511_v8 }
 0x125   :  { %1638 = vmatpush3.bf16.xpose.msk.msra.mxu0 %vm2100_vm2, %v1636_v10 }
 0x126   :  { %v970_v22 = vmul.f32 %v514_v19, %v514_v19  ;;  %v1425_v23 = vpop.f32.mrb[24].mxu0  ;;  %v791_v25 = vpop.f32.mrb[32].mxu1  ;;  %1639 = vmatprep.subr.bf16.mxu0 %v1813_v5 }
 0x127   :  { %v830_v15 = vmul.f32 %v791_v25, %v503_v48  ;;  %v1426_v26 = vpop.f32.mrb[25].mxu0  ;;  %v793_v29 = vpop.f32.mrb[33].mxu1  ;;  %v2161_v37 = vmul.f32 %v791_v25, %v791_v25 }
 0x128   :  { %v1676_v32 = vpack.c.bf16 %v970_v22, %v969_v21  ;;  %v1427_v33 = vadd.f32 %v1426_v26, %v1425_v23  ;;  %v1428_v34 = vpop.f32.mrb[26].mxu0  ;;  %v794_v36 = vpop.f32.mrb[34].mxu1 }
 0x129   :  { %v831_v11 = vmul.f32 %v794_v36, %v506_v52  ;;  %v2163_v17 = vmul.f32 %v794_v36, %v794_v36  ;;  %v1429_v38 = vpop.f32.mrb[27].mxu0  ;;  %v796_v39 = vpop.f32.mrb[35].mxu1 }
 0x12a   :  { %v519_v40 = vadd.f32 %v1427_v33, %v2092_v27  ;;  %v1430_v41 = vadd.f32 %v1429_v38, %v1428_v34  ;;  %1678 = vmatpush3.bf16.xpose.msk.msra.mxu1 %vm2100_vm2, %v1676_v32 }
 0x12b   :  { %v1640_v42 = vpack.c.bf16 %v831_v11, %v830_v15  ;;  %v1704_v43 = vpack.c.bf16 %v2163_v17, %v2161_v37  ;;  %1679 = vmatprep.subr.bf16.mxu1 %v1813_v5 }
 0x12c   :  { %v522_v45 = vadd.f32 %v1430_v41, %v2096_v30  ;;  %v971_v46 = vmul.f32 %v519_v40, %v519_v40 }
 0x12d   :  { %1642 = vmatpush3.bf16.xpose.msk.msra.mxu0 %vm2100_vm2, %v1640_v42 }
 0x12e   :  { %v972_v47 = vmul.f32 %v522_v45, %v522_v45  ;;  %v1431_v48 = vpop.f32.mrb[28].mxu0  ;;  %v799_v49 = vpop.f32.mrb[36].mxu1  ;;  %1643 = vmatprep.subr.bf16.mxu0 %v1813_v5 }
 0x12f   :  { %v832_v27 = vmul.f32 %v799_v49, %v511_v8  ;;  %v1432_v50 = vpop.f32.mrb[29].mxu0  ;;  %v801_v52 = vpop.f32.mrb[37].mxu1  ;;  %v1103_v16 = vmul.f32 %v799_v49, %v799_v49 }
 0x130   :  { %v1680_v53 = vpack.c.bf16 %v972_v47, %v971_v46  ;;  %v1433_v55 = vadd.f32 %v1432_v50, %v1431_v48  ;;  %v1434_v57 = vpop.f32.mrb[30].mxu0  ;;  %v802_v58 = vpop.f32.mrb[38].mxu1 }
 0x131   :  { %v833_v59 = vmul.f32 %v802_v58, %v514_v19  ;;  %v1104_v60 = vmul.f32 %v802_v58, %v802_v58  ;;  %v1435_v30 = vpop.f32.mrb[31].mxu0  ;;  %v804_v61 = vpop.f32.mrb[39].mxu1 }
 0x132   :  { %v527_v63 = vadd.f32 %v2090_v24, %v1433_v55  ;;  %v1436_v0 = vadd.f32 %v1435_v30, %v1434_v57  ;;  %1682 = vmatpush3.bf16.xpose.msk.msra.mxu1 %vm2100_vm2, %v1680_v53 }
 0x133   :  { %v1644_v1 = vpack.c.bf16 %v833_v59, %v832_v27  ;;  %v1708_v3 = vpack.c.bf16 %v1104_v60, %v1103_v16  ;;  %1683 = vmatprep.subr.bf16.mxu1 %v1813_v5 }
 0x134   :  { %v530_v4 = vadd.f32 %v2094_v28, %v1436_v0  ;;  %v973_v7 = vmul.f32 %v527_v63, %v527_v63 }
 0x135   :  { %1646 = vmatpush3.bf16.xpose.msk.msra.mxu0 %vm2100_vm2, %v1644_v1 }
 0x136   :  { %v974_v8 = vmul.f32 %v530_v4, %v530_v4  ;;  %v807_v9 = vpop.f32.mrb[40].mxu1  ;;  %1647 = vmatprep.subr.bf16.mxu0 %v1813_v5 }
 0x137   :  { %v834_v10 = vmul.f32 %v807_v9, %v519_v40  ;;  %v809_v24 = vpop.f32.mrb[41].mxu1  ;;  %v1105_v22 = vmul.f32 %v807_v9, %v807_v9  ;;  %v1816_v40 = vmov 1.0  }
 0x138   :  { %v1684_v19 = vpack.c.bf16 %v974_v8, %v973_v7  ;;  %v810_v21 = vpop.f32.mrb[42].mxu1 }
 0x139   :  { %v835_v23 = vmul.f32 %v810_v21, %v522_v45  ;;  %v1106_v25 = vmul.f32 %v810_v21, %v810_v21  ;;  %v812_v15 = vpop.f32.mrb[43].mxu1 }
 0x13a   :  { %1686 = vmatpush3.bf16.xpose.msk.msra.mxu1 %vm2100_vm2, %v1684_v19 }
 0x13b   :  { %v1648_v28 = vpack.c.bf16 %v835_v23, %v834_v10  ;;  %v1712_v26 = vpack.c.bf16 %v1106_v25, %v1105_v22 }
 0x13d   :  { %1650 = vmatpush3.bf16.xpose.msk.msra.mxu0 %vm2100_vm2, %v1648_v28 }
 0x13e   :  { %v815_v29 = vpop.f32.mrb[44].mxu1  ;;  %1651 = vmatprep.subr.bf16.mxu0 %v1813_v5 }
 0x13f   :  { %v836_v32 = vmul.f32 %v815_v29, %v527_v63  ;;  %v817_v33 = vpop.f32.mrb[45].mxu1  ;;  %v1107_v36 = vmul.f32 %v815_v29, %v815_v29 }
 0x140   :  { %v818_v34 = vpop.f32.mrb[46].mxu1 }
 0x141   :  { %v837_v11 = vmul.f32 %v818_v34, %v530_v4  ;;  %v1108_v38 = vmul.f32 %v818_v34, %v818_v34  ;;  %v820_v39 = vpop.f32.mrb[47].mxu1  ;;  %1586 = vmatmul.mubr.msk.f32.vlgmr.msra.gmra.mrb[48].mxu1 %vm314_vm0, %v1816_v40 }
 0x143   :  { %v1652_v41 = vpack.c.bf16 %v837_v11, %v836_v32  ;;  %v1716_v42 = vpack.c.bf16 %v1108_v38, %v1107_v36 }
 0x145   :  { %1654 = vmatpush3.bf16.xpose.msk.msra.mxu0 %vm2100_vm2, %v1652_v41 }
 0x146   :  { %1687 = vmatprep.subr.bf16.mxu0 %v1813_v5 }
 0x14c   :  { %1551 = vmatmul.mubr.msk.f32.vlgmr.msra.gmra.mrb[32].mxu0 %vm314_vm0, %v1816_v40 }
 0x14d   :  { %1690 = vmatpush3.bf16.xpose.msk.msra.mxu0 %vm2100_vm2, %v1688_v62  ;;  %1620 = vmatprep.mubr.msk.f32.mxu0 %vm1814_vm1, %v1815_v6 }
 0x14e   :  { %1691 = vmatprep.subr.bf16.mxu0 %v1813_v5 }
 0x155   :  { %1694 = vmatpush3.bf16.xpose.msk.msra.mxu0 %vm2100_vm2, %v1692_v31 }
 0x156   :  { %1695 = vmatprep.subr.bf16.mxu0 %v1813_v5 }
 0x15d   :  { %1698 = vmatpush3.bf16.xpose.msk.msra.mxu0 %vm2100_vm2, %v1696_v51 }
 0x15e   :  { %1699 = vmatprep.subr.bf16.mxu0 %v1813_v5 }
 0x165   :  { %1702 = vmatpush3.bf16.xpose.msk.msra.mxu0 %vm2100_vm2, %v1700_v12 }
 0x166   :  { %1703 = vmatprep.subr.bf16.mxu0 %v1813_v5 }
 0x16d   :  { %1706 = vmatpush3.bf16.xpose.msk.msra.mxu0 %vm2100_vm2, %v1704_v43 }
 0x16e   :  { %1707 = vmatprep.subr.bf16.mxu0 %v1813_v5 }
 0x175   :  { %1710 = vmatpush3.bf16.xpose.msk.msra.mxu0 %vm2100_vm2, %v1708_v3 }
 0x176   :  { %1711 = vmatprep.subr.bf16.mxu0 %v1813_v5 }
 0x17d   :  { %1714 = vmatpush3.bf16.xpose.msk.msra.mxu0 %vm2100_vm2, %v1712_v26 }
 0x17e   :  { %1715 = vmatprep.subr.bf16.mxu0 %v1813_v5 }
 0x185   :  { %1718 = vmatpush3.bf16.xpose.msk.msra.mxu0 %vm2100_vm2, %v1716_v42 }
 0x18c   :  { %1621 = vmatmul.mubr.msk.f32.vlgmr.msra.gmra.mrb[34].mxu0 %vm314_vm0, %v1816_v40 }
 0x214   :  { %v1089_v6 = vpop.f32.mrb[48].mxu1 }
 0x215   :  { %v1227_v54 = vmax.f32 %v1089_v6, 1e-16  ;;  %v1587_v56 = vpop.f32.mrb[49].mxu1 }
 0x217   :  { %1808 = vrsqrt.f32 %v1227_v54 }
 0x21f   :  { %v955_v62 = vpop.f32.mrb[32].mxu0 }
 0x220   :  { %v1552_v20 = vpop.f32.mrb[33].mxu0 }
 0x221   :  { %v1809_v14 = vpop.eup %1808 }
 0x222   :  { %v1229_v31 = vmul.f32 %v1809_v14, %v955_v62 }
 0x25f   :  { %v1223_v44 = vpop.f32.mrb[34].mxu0 }
 0x260   :  { %v1230_v13 = vmax.f32 %v1223_v44, 1e-16  ;;  %v1622_v51 = vpop.f32.mrb[35].mxu0 }
 0x262   :  { %1810 = vrsqrt.f32 %v1230_v13 }
 0x26c   :  { %v1811_v2 = vpop.eup %1810 }
 0x26d   :  { %v1232_v18 = vmul.f32 %v1811_v2, %v1229_v31 }
 0x26f   :  { %1233 = vst [vmem:[%s2241_s4] sm:$0x1] %v1232_v18 }

</bundles_post_ra>
